<compile_context>
chip_gen: v5e
topology: v5e:2x2
jax: 0.10.0
libtpu: 0.0.40
codegen_flags: <defaults>
</compile_context>

<pallas_src>
import numpy as np
import jax
import jax.numpy as jnp
from jax.experimental import pallas as pl
from jax.experimental.pallas import tpu as pltpu

EPS = 1e-5  # nn.LayerNorm default eps


def _round_up(v, m):
    return ((v + m - 1) // m) * m


# ---------------------------------------------------------------------------
# Packed-parameter layout (static metadata) and packing
# ---------------------------------------------------------------------------
def _build_layout(embed_dim, cond_dim, hidden_dim):
    n = len(hidden_dim)
    wcol = max([embed_dim, cond_dim] + list(hidden_dim))   # weight column span
    width = wcol + 3                                        # + bias/gamma/beta
    layer_dims = [('input', embed_dim, hidden_dim[0])]
    for i in range(n - 1):
        layer_dims.append(('enc%d' % i, hidden_dim[i], hidden_dim[i + 1]))
    for j, i in enumerate(range(n - 1, 0, -1)):
        layer_dims.append(('dec%d' % j, hidden_dim[i], hidden_dim[i - 1]))

    blocks = {}
    row = 0
    for name, di, do in layer_dims:
        blocks[name] = (row, di, do)
        row += _round_up(do, 8)          # keep every block sublane-aligned
    blocks['out'] = (row, hidden_dim[0], embed_dim)
    row += _round_up(embed_dim, 8)

    # fused cond block: enc cond dims then dec cond dims, each padded to 8 rows
    cond_dims = [hidden_dim[i] for i in range(n - 1)] + \
                [hidden_dim[i] for i in range(n - 1, 0, -1)]
    cond_row = row
    cond_sub = []
    sub = 0
    for d in cond_dims:
        cond_sub.append((sub, d))
        sub += _round_up(d, 8)
    cond_rows = sub
    total_rows = _round_up(row + cond_rows, 8)
    return dict(n=n, embed_dim=embed_dim, cond_dim=cond_dim,
                hidden=tuple(hidden_dim), wcol=wcol, width=width,
                blocks=blocks, cond_row=cond_row, cond_rows=cond_rows,
                cond_sub=tuple(cond_sub), total_rows=total_rows)


def _pack_params(params, layout):
    """One flat f32 buffer: weight at cols [0:din], bias/gamma/beta at
    cols [wcol, wcol+1, wcol+2]."""
    wcol = layout['wcol']
    buf = np.zeros((layout['total_rows'], layout['width']), np.float32)

    def put(name, p, with_ln):
        r, di, do = layout['blocks'][name]
        buf[r:r + do, :di] = np.asarray(p['w'], np.float32)
        buf[r:r + do, wcol] = np.asarray(p['b'], np.float32)
        if with_ln:
            buf[r:r + do, wcol + 1] = np.asarray(p['gamma'], np.float32)
            buf[r:r + do, wcol + 2] = np.asarray(p['beta'], np.float32)

    n = layout['n']
    put('input', params['input'], True)
    for i in range(n - 1):
        put('enc%d' % i, params['enc'][i], True)
    for i in range(n - 1):
        put('dec%d' % i, params['dec'][i], True)
    put('out', params['out'], False)

    cr, cd = layout['cond_row'], layout['cond_dim']
    cond_params = list(params['enc_cond']) + list(params['dec_cond'])
    for (sub, d), p in zip(layout['cond_sub'], cond_params):
        buf[cr + sub:cr + sub + d, :cd] = np.asarray(p['w'], np.float32)
        buf[cr + sub:cr + sub + d, wcol] = np.asarray(p['b'], np.float32)
    return jnp.asarray(buf)


# ---------------------------------------------------------------------------
# Fully fused kernel (built per network structure / cond presence)
# ---------------------------------------------------------------------------
def _make_fused_kernel(layout, has_cond):
    """Kernel over a (D, bb) batch block.

    Ref order: x, [c,] param_buf, out.
    All activations (D_feat, bb); matmuls are W @ h; LayerNorm reduces the
    feature (sublane) axis with the centered two-pass variance.
    """
    wcol = layout['wcol']
    n = layout['n']
    blocks = layout['blocks']

    def kernel(*refs):
        if has_cond:
            x_ref, c_ref, p_ref, out_ref = refs
        else:
            x_ref, p_ref, out_ref = refs

        h = x_ref[...].astype(jnp.float32)           # (embed_dim, bb)

        def ln_silu(h, name):
            """SiLU(LayerNorm(W @ h + b)); Dropout(p=0.0) is the identity."""
            r, di, do = blocks[name]
            w = p_ref[r:r + do, 0:di]                # (do, di)
            b = p_ref[r:r + do, wcol:wcol + 1]       # (do, 1) -> lane broadcast
            g = p_ref[r:r + do, wcol + 1:wcol + 2]
            beta = p_ref[r:r + do, wcol + 2:wcol + 3]
            y = jnp.dot(w, h, preferred_element_type=jnp.float32) + b
            mean = jnp.mean(y, axis=0, keepdims=True)
            d = y - mean                              # centered (stable) form
            var = jnp.mean(d * d, axis=0, keepdims=True)
            yn = d * jax.lax.rsqrt(var + EPS)
            yn = yn * g + beta
            return yn * jax.nn.sigmoid(yn)            # SiLU

        # ---- all conditional embeddings in one matmul (sublane-aligned slices)
        if has_cond:
            c = c_ref[...].astype(jnp.float32)        # (cond_dim, bb)
            cr, crows, cd = layout['cond_row'], layout['cond_rows'], layout['cond_dim']
            wc = p_ref[cr:cr + crows, 0:cd]
            bc = p_ref[cr:cr + crows, wcol:wcol + 1]
            cond_all = jnp.dot(wc, c, preferred_element_type=jnp.float32) + bc
            cond_embs = [cond_all[s:s + d, :] for (s, d) in layout['cond_sub']]

        # ---- input layer ----
        h = ln_silu(h, 'input')

        # ---- encoder (skip stack stays in vregs/VMEM; no HBM traffic) ----
        skips = []
        for i in range(n - 1):
            skips.append(h)
            if has_cond:
                h = h + cond_embs[i]
            h = ln_silu(h, 'enc%d' % i)

        # ---- decoder with skip connections ----
        for i in range(n - 1):
            if has_cond:
                h = h + cond_embs[(n - 1) + i]
            h = ln_silu(h, 'dec%d' % i)
            h = h + skips[-1 - i]

        # ---- output layer ----
        ro, di, do = blocks['out']
        w_out = p_ref[ro:ro + do, 0:di]
        b_out = p_ref[ro:ro + do, wcol:wcol + 1]
        out = jnp.dot(w_out, h, preferred_element_type=jnp.float32) + b_out
        out_ref[...] = out.astype(out_ref.dtype)

    return kernel


# ---------------------------------------------------------------------------
# Wrapper: one pallas_call for the whole network, batch gridded on lanes
# ---------------------------------------------------------------------------
def generator2_forward(params, x, c=None, *, batch_block=1024):
    """x: (B, embed_dim), c: (B, cond_dim) or None -> (B, embed_dim)."""
    layout = params['layout']
    pbuf = params['packed']
    dtype = x.dtype
    B = x.shape[0]
    embed_dim = layout['embed_dim']
    cond_dim = layout['cond_dim']
    has_cond = c is not None

    # lane-dense layout: features on sublanes, batch on lanes
    xT = x.T                                      # (embed_dim, B)
    cT = c.T if has_cond else None                # (cond_dim, B)

    # 128-aligned batch block; pad B so every batch goes through the grid
    # (bounded per-step VMEM footprint, unmasked lane-dense stores).
    bb = max(128, min(_round_up(batch_block, 128), _round_up(B, 128)))
    Bp = _round_up(B, bb)
    if Bp != B:
        xT = jnp.pad(xT, ((0, 0), (0, Bp - B)))
        if has_cond:
            cT = jnp.pad(cT, ((0, 0), (0, Bp - B)))

    grid = (Bp // bb,)
    inputs = [xT]
    in_specs = [pl.BlockSpec((embed_dim, bb), lambda i: (0, i))]
    if has_cond:
        inputs.append(cT)
        in_specs.append(pl.BlockSpec((cond_dim, bb), lambda i: (0, i)))
    inputs.append(pbuf)
    in_specs.append(pl.BlockSpec(pbuf.shape, lambda i: (0, 0)))   # resident
    out_specs = pl.BlockSpec((embed_dim, bb), lambda i: (0, i))

    kernel = _make_fused_kernel(layout, has_cond)
    outT = pl.pallas_call(
        kernel,
        out_shape=jax.ShapeDtypeStruct((embed_dim, Bp), dtype),
        grid=grid,
        in_specs=in_specs,
        out_specs=out_specs,
        compiler_params=pltpu.CompilerParams(
            dimension_semantics=("parallel",)),   # v7x: batch splits across TCs
    )(*inputs)

    return outT[:, :B].T


# ---------------------------------------------------------------------------
# Parameter init (deterministic, synthetic) + packed buffer
# ---------------------------------------------------------------------------
def init_params(key, embed_dim, cond_dim, hidden_dim, dtype=jnp.float32):
    n = len(hidden_dim)
    keys = iter(jax.random.split(key, 256))

    def lin(din, dout):
        w = jax.random.normal(next(keys), (dout, din), dtype) / jnp.sqrt(
            jnp.asarray(din, dtype))
        b = jax.random.normal(next(keys), (dout,), dtype) * 0.02
        return {'w': w, 'b': b}

    def ln_layer(din, dout):
        l = lin(din, dout)
        l['gamma'] = 1.0 + 0.1 * jax.random.normal(next(keys), (dout,), dtype)
        l['beta'] = 0.1 * jax.random.normal(next(keys), (dout,), dtype)
        return l

    params = {
        'num_layers': n,
        'input': ln_layer(embed_dim, hidden_dim[0]),
        'enc': [ln_layer(hidden_dim[i], hidden_dim[i + 1]) for i in range(n - 1)],
        'dec': [ln_layer(hidden_dim[i], hidden_dim[i - 1])
                for i in range(n - 1, 0, -1)],
        'out': lin(hidden_dim[0], embed_dim),
        'enc_cond': [lin(cond_dim, hidden_dim[i]) for i in range(n - 1)],
        'dec_cond': [lin(cond_dim, hidden_dim[i]) for i in range(n - 1, 0, -1)],
    }
    layout = _build_layout(embed_dim, cond_dim, hidden_dim)
    params['layout'] = layout
    params['packed'] = _pack_params(params, layout)
    return params


# ---------------------------------------------------------------------------
# Pure-JAX reference (correctness check), standard (B, D) layout
# ---------------------------------------------------------------------------
def ref_forward(params, x, c=None):
    def lin(p, v):
        return v @ p['w'].T + p['b']

    def block(p, v):
        y = v @ p['w'].T + p['b']
        m = jnp.mean(y, -1, keepdims=True)
        va = jnp.mean((y - m) ** 2, -1, keepdims=True)
        y = (y - m) / jnp.sqrt(va + EPS) * p['gamma'] + p['beta']
        return y * jax.nn.sigmoid(y)

    n = params['num_layers']
    h = block(params['input'], x)
    hidden = []
    for i in range(n - 1):
        hidden.append(h)
        if c is not None:
            h = h + lin(params['enc_cond'][i], c)
        h = block(params['enc'][i], h)
    for i in range(n - 1):
        if c is not None:
            h = h + lin(params['dec_cond'][i], c)
        h = block(params['dec'][i], h)
        h = h + hidden[-1 - i]
    return lin(params['out'], h)


# ---------------------------------------------------------------------------
if __name__ == "__main__":
    # Small shapes consistent with the module (embed_dim, cond_dim, hidden pyramid)
    embed_dim = 32
    cond_dim = 16
    hidden_dim = [32, 16, 16, 8, 8]
    batch = 8

    key = jax.random.PRNGKey(0)
    kp, kx, kc, kx2, kc2 = jax.random.split(key, 5)

    params = init_params(kp, embed_dim, cond_dim, hidden_dim)
    x = jax.random.normal(kx, (batch, embed_dim), jnp.float32)
    c = jax.random.normal(kc, (batch, cond_dim), jnp.float32)

    # 1) conditioned forward: whole network in one fused pallas_call
    out = jax.block_until_ready(generator2_forward(params, x, c))
    ref = ref_forward(params, x, c)
    assert out.shape == (batch, embed_dim), out.shape
    assert jnp.allclose(out, ref, atol=1e-2, rtol=1e-2), \
        float(jnp.max(jnp.abs(out - ref)))

    # 2) unconditioned forward (c is None -> cond path compiled away)
    out_nc = jax.block_until_ready(generator2_forward(params, x, None))
    ref_nc = ref_forward(params, x, None)
    assert jnp.allclose(out_nc, ref_nc, atol=1e-2, rtol=1e-2), \
        float(jnp.max(jnp.abs(out_nc - ref_nc)))

    # 3) larger batch, NOT a multiple of the block: exercises padding + grid
    big_b = 300
    xb = jax.random.normal(kx2, (big_b, embed_dim), jnp.float32)
    cb = jax.random.normal(kc2, (big_b, cond_dim), jnp.float32)
    out_b = jax.block_until_ready(
        generator2_forward(params, xb, cb, batch_block=128))
    ref_b = ref_forward(params, xb, cb)
    assert out_b.shape == (big_b, embed_dim), out_b.shape
    assert jnp.allclose(out_b, ref_b, atol=1e-2, rtol=1e-2), \
        float(jnp.max(jnp.abs(out_b - ref_b)))

    print("KERNEL_OK")
</pallas_src>

<mosaic_0001>
module attributes {stable_mosaic.version = 11 : i64} {
  func.func @kernel(%arg0: i32, %arg1: memref<32x128xf32, #tpu.memory_space<vmem>>, %arg2: memref<16x128xf32, #tpu.memory_space<vmem>>, %arg3: memref<304x35xf32, #tpu.memory_space<vmem>>, %arg4: memref<32x128xf32, #tpu.memory_space<vmem>>) attributes {dimension_semantics = [#tpu.dimension_semantics<parallel>], iteration_bounds = array<i64: 1>, scalar_prefetch = 0 : i64, scratch_operands = 0 : i64, tpu.core_type = #tpu.core_type<tc>, window_params = [{transform_indices = @transform_0, window_bounds = array<i64: 32, 128>}, {transform_indices = @transform_1, window_bounds = array<i64: 16, 128>}, {pipeline_mode = #tpu.pipeline_mode<synchronous>, transform_indices = @transform_2, window_bounds = array<i64: 304, 35>}, {transform_indices = @transform_3, window_bounds = array<i64: 32, 128>}]} {
    %c0 = arith.constant 0 : index
    %c0_0 = arith.constant 0 : index
    %0 = vector.load %arg1[%c0, %c0_0] : memref<32x128xf32, #tpu.memory_space<vmem>>, vector<32x128xf32>
    %c0_1 = arith.constant 0 : index
    %c0_2 = arith.constant 0 : index
    %1 = vector.load %arg2[%c0_1, %c0_2] : memref<16x128xf32, #tpu.memory_space<vmem>>, vector<16x128xf32>
    %c184 = arith.constant 184 : index
    %c0_3 = arith.constant 0 : index
    %2 = vector.load %arg3[%c184, %c0_3] : memref<304x35xf32, #tpu.memory_space<vmem>>, vector<120x16xf32>
    %c184_4 = arith.constant 184 : index
    %c32 = arith.constant 32 : index
    %3 = vector.load %arg3[%c184_4, %c32] : memref<304x35xf32, #tpu.memory_space<vmem>>, vector<120x1xf32>
    %cst = arith.constant dense<0.000000e+00> : vector<120x128xf32>
    %4 = tpu.matmul %2, %1, %cst {dimension_numbers = #tpu.dot_dimension_numbers<[1], [0], [0], [1], [0, 0, 1, 1], [], []>} : vector<120x16xf32>, vector<16x128xf32>, vector<120x128xf32> -> vector<120x128xf32>
    %5 = vector.broadcast %3 : vector<120x1xf32> to vector<120x128xf32>
    %6 = arith.addf %4, %5 : vector<120x128xf32>
    %7 = vector.extract_strided_slice %6 {offsets = [0, 0], sizes = [32, 128], strides = [1, 1]} : vector<120x128xf32> to vector<32x128xf32>
    %8 = vector.extract_strided_slice %6 {offsets = [32, 0], sizes = [16, 128], strides = [1, 1]} : vector<120x128xf32> to vector<16x128xf32>
    %9 = vector.extract_strided_slice %6 {offsets = [48, 0], sizes = [16, 128], strides = [1, 1]} : vector<120x128xf32> to vector<16x128xf32>
    %10 = vector.extract_strided_slice %6 {offsets = [64, 0], sizes = [8, 128], strides = [1, 1]} : vector<120x128xf32> to vector<8x128xf32>
    %11 = vector.extract_strided_slice %6 {offsets = [72, 0], sizes = [8, 128], strides = [1, 1]} : vector<120x128xf32> to vector<8x128xf32>
    %12 = vector.extract_strided_slice %6 {offsets = [80, 0], sizes = [8, 128], strides = [1, 1]} : vector<120x128xf32> to vector<8x128xf32>
    %13 = vector.extract_strided_slice %6 {offsets = [88, 0], sizes = [16, 128], strides = [1, 1]} : vector<120x128xf32> to vector<16x128xf32>
    %14 = vector.extract_strided_slice %6 {offsets = [104, 0], sizes = [16, 128], strides = [1, 1]} : vector<120x128xf32> to vector<16x128xf32>
    %c0_5 = arith.constant 0 : index
    %c0_6 = arith.constant 0 : index
    %15 = vector.load %arg3[%c0_5, %c0_6] : memref<304x35xf32, #tpu.memory_space<vmem>>, vector<32x32xf32>
    %c0_7 = arith.constant 0 : index
    %c32_8 = arith.constant 32 : index
    %16 = vector.load %arg3[%c0_7, %c32_8] : memref<304x35xf32, #tpu.memory_space<vmem>>, vector<32x1xf32>
    %c0_9 = arith.constant 0 : index
    %c33 = arith.constant 33 : index
    %17 = vector.load %arg3[%c0_9, %c33] : memref<304x35xf32, #tpu.memory_space<vmem>>, vector<32x1xf32>
    %c0_10 = arith.constant 0 : index
    %c34 = arith.constant 34 : index
    %18 = vector.load %arg3[%c0_10, %c34] : memref<304x35xf32, #tpu.memory_space<vmem>>, vector<32x1xf32>
    %cst_11 = arith.constant dense<0.000000e+00> : vector<32x128xf32>
    %19 = tpu.matmul %15, %0, %cst_11 {dimension_numbers = #tpu.dot_dimension_numbers<[1], [0], [0], [1], [0, 0, 1, 1], [], []>} : vector<32x32xf32>, vector<32x128xf32>, vector<32x128xf32> -> vector<32x128xf32>
    %20 = vector.broadcast %16 : vector<32x1xf32> to vector<32x128xf32>
    %21 = arith.addf %19, %20 : vector<32x128xf32>
    %cst_12 = arith.constant dense<0.000000e+00> : vector<128xf32>
    %22 = vector.multi_reduction <add>, %21, %cst_12 [0] : vector<32x128xf32> to vector<128xf32>
    %23 = vector.shape_cast %22 : vector<128xf32> to vector<1x128xf32>
    %cst_13 = arith.constant 3.200000e+01 : f32
    %24 = vector.broadcast %cst_13 : f32 to vector<1x128xf32>
    %25 = arith.divf %23, %24 : vector<1x128xf32>
    %26 = vector.broadcast %25 : vector<1x128xf32> to vector<32x128xf32>
    %27 = arith.subf %21, %26 : vector<32x128xf32>
    %28 = arith.mulf %27, %27 : vector<32x128xf32>
    %cst_14 = arith.constant dense<0.000000e+00> : vector<128xf32>
    %29 = vector.multi_reduction <add>, %28, %cst_14 [0] : vector<32x128xf32> to vector<128xf32>
    %30 = vector.shape_cast %29 : vector<128xf32> to vector<1x128xf32>
    %cst_15 = arith.constant 3.200000e+01 : f32
    %31 = vector.broadcast %cst_15 : f32 to vector<1x128xf32>
    %32 = arith.divf %30, %31 : vector<1x128xf32>
    %cst_16 = arith.constant 9.99999974E-6 : f32
    %33 = vector.broadcast %cst_16 : f32 to vector<1x128xf32>
    %34 = arith.addf %32, %33 : vector<1x128xf32>
    %35 = math.rsqrt %34 : vector<1x128xf32>
    %36 = vector.broadcast %35 : vector<1x128xf32> to vector<32x128xf32>
    %37 = arith.mulf %27, %36 : vector<32x128xf32>
    %38 = vector.broadcast %17 : vector<32x1xf32> to vector<32x128xf32>
    %39 = arith.mulf %37, %38 : vector<32x128xf32>
    %40 = vector.broadcast %18 : vector<32x1xf32> to vector<32x128xf32>
    %41 = arith.addf %39, %40 : vector<32x128xf32>
    %42 = arith.negf %41 : vector<32x128xf32>
    %43 = math.exp %42 : vector<32x128xf32>
    %cst_17 = arith.constant 1.000000e+00 : f32
    %44 = vector.broadcast %cst_17 : f32 to vector<32x128xf32>
    %45 = arith.addf %44, %43 : vector<32x128xf32>
    %46 = arith.divf %44, %45 : vector<32x128xf32>
    %47 = arith.mulf %41, %46 : vector<32x128xf32>
    %48 = arith.addf %47, %7 : vector<32x128xf32>
    %c32_18 = arith.constant 32 : index
    %c0_19 = arith.constant 0 : index
    %49 = vector.load %arg3[%c32_18, %c0_19] : memref<304x35xf32, #tpu.memory_space<vmem>>, vector<16x32xf32>
    %c32_20 = arith.constant 32 : index
    %c32_21 = arith.constant 32 : index
    %50 = vector.load %arg3[%c32_20, %c32_21] : memref<304x35xf32, #tpu.memory_space<vmem>>, vector<16x1xf32>
    %c32_22 = arith.constant 32 : index
    %c33_23 = arith.constant 33 : index
    %51 = vector.load %arg3[%c32_22, %c33_23] : memref<304x35xf32, #tpu.memory_space<vmem>>, vector<16x1xf32>
    %c32_24 = arith.constant 32 : index
    %c34_25 = arith.constant 34 : index
    %52 = vector.load %arg3[%c32_24, %c34_25] : memref<304x35xf32, #tpu.memory_space<vmem>>, vector<16x1xf32>
    %cst_26 = arith.constant dense<0.000000e+00> : vector<16x128xf32>
    %53 = tpu.matmul %49, %48, %cst_26 {dimension_numbers = #tpu.dot_dimension_numbers<[1], [0], [0], [1], [0, 0, 1, 1], [], []>} : vector<16x32xf32>, vector<32x128xf32>, vector<16x128xf32> -> vector<16x128xf32>
    %54 = vector.broadcast %50 : vector<16x1xf32> to vector<16x128xf32>
    %55 = arith.addf %53, %54 : vector<16x128xf32>
    %cst_27 = arith.constant dense<0.000000e+00> : vector<128xf32>
    %56 = vector.multi_reduction <add>, %55, %cst_27 [0] : vector<16x128xf32> to vector<128xf32>
    %57 = vector.shape_cast %56 : vector<128xf32> to vector<1x128xf32>
    %cst_28 = arith.constant 1.600000e+01 : f32
    %58 = vector.broadcast %cst_28 : f32 to vector<1x128xf32>
    %59 = arith.divf %57, %58 : vector<1x128xf32>
    %60 = vector.broadcast %59 : vector<1x128xf32> to vector<16x128xf32>
    %61 = arith.subf %55, %60 : vector<16x128xf32>
    %62 = arith.mulf %61, %61 : vector<16x128xf32>
    %cst_29 = arith.constant dense<0.000000e+00> : vector<128xf32>
    %63 = vector.multi_reduction <add>, %62, %cst_29 [0] : vector<16x128xf32> to vector<128xf32>
    %64 = vector.shape_cast %63 : vector<128xf32> to vector<1x128xf32>
    %cst_30 = arith.constant 1.600000e+01 : f32
    %65 = vector.broadcast %cst_30 : f32 to vector<1x128xf32>
    %66 = arith.divf %64, %65 : vector<1x128xf32>
    %cst_31 = arith.constant 9.99999974E-6 : f32
    %67 = vector.broadcast %cst_31 : f32 to vector<1x128xf32>
    %68 = arith.addf %66, %67 : vector<1x128xf32>
    %69 = math.rsqrt %68 : vector<1x128xf32>
    %70 = vector.broadcast %69 : vector<1x128xf32> to vector<16x128xf32>
    %71 = arith.mulf %61, %70 : vector<16x128xf32>
    %72 = vector.broadcast %51 : vector<16x1xf32> to vector<16x128xf32>
    %73 = arith.mulf %71, %72 : vector<16x128xf32>
    %74 = vector.broadcast %52 : vector<16x1xf32> to vector<16x128xf32>
    %75 = arith.addf %73, %74 : vector<16x128xf32>
    %76 = arith.negf %75 : vector<16x128xf32>
    %77 = math.exp %76 : vector<16x128xf32>
    %cst_32 = arith.constant 1.000000e+00 : f32
    %78 = vector.broadcast %cst_32 : f32 to vector<16x128xf32>
    %79 = arith.addf %78, %77 : vector<16x128xf32>
    %80 = arith.divf %78, %79 : vector<16x128xf32>
    %81 = arith.mulf %75, %80 : vector<16x128xf32>
    %82 = arith.addf %81, %8 : vector<16x128xf32>
    %c48 = arith.constant 48 : index
    %c0_33 = arith.constant 0 : index
    %83 = vector.load %arg3[%c48, %c0_33] : memref<304x35xf32, #tpu.memory_space<vmem>>, vector<16x16xf32>
    %c48_34 = arith.constant 48 : index
    %c32_35 = arith.constant 32 : index
    %84 = vector.load %arg3[%c48_34, %c32_35] : memref<304x35xf32, #tpu.memory_space<vmem>>, vector<16x1xf32>
    %c48_36 = arith.constant 48 : index
    %c33_37 = arith.constant 33 : index
    %85 = vector.load %arg3[%c48_36, %c33_37] : memref<304x35xf32, #tpu.memory_space<vmem>>, vector<16x1xf32>
    %c48_38 = arith.constant 48 : index
    %c34_39 = arith.constant 34 : index
    %86 = vector.load %arg3[%c48_38, %c34_39] : memref<304x35xf32, #tpu.memory_space<vmem>>, vector<16x1xf32>
    %cst_40 = arith.constant dense<0.000000e+00> : vector<16x128xf32>
    %87 = tpu.matmul %83, %82, %cst_40 {dimension_numbers = #tpu.dot_dimension_numbers<[1], [0], [0], [1], [0, 0, 1, 1], [], []>} : vector<16x16xf32>, vector<16x128xf32>, vector<16x128xf32> -> vector<16x128xf32>
    %88 = vector.broadcast %84 : vector<16x1xf32> to vector<16x128xf32>
    %89 = arith.addf %87, %88 : vector<16x128xf32>
    %cst_41 = arith.constant dense<0.000000e+00> : vector<128xf32>
    %90 = vector.multi_reduction <add>, %89, %cst_41 [0] : vector<16x128xf32> to vector<128xf32>
    %91 = vector.shape_cast %90 : vector<128xf32> to vector<1x128xf32>
    %cst_42 = arith.constant 1.600000e+01 : f32
    %92 = vector.broadcast %cst_42 : f32 to vector<1x128xf32>
    %93 = arith.divf %91, %92 : vector<1x128xf32>
    %94 = vector.broadcast %93 : vector<1x128xf32> to vector<16x128xf32>
    %95 = arith.subf %89, %94 : vector<16x128xf32>
    %96 = arith.mulf %95, %95 : vector<16x128xf32>
    %cst_43 = arith.constant dense<0.000000e+00> : vector<128xf32>
    %97 = vector.multi_reduction <add>, %96, %cst_43 [0] : vector<16x128xf32> to vector<128xf32>
    %98 = vector.shape_cast %97 : vector<128xf32> to vector<1x128xf32>
    %cst_44 = arith.constant 1.600000e+01 : f32
    %99 = vector.broadcast %cst_44 : f32 to vector<1x128xf32>
    %100 = arith.divf %98, %99 : vector<1x128xf32>
    %cst_45 = arith.constant 9.99999974E-6 : f32
    %101 = vector.broadcast %cst_45 : f32 to vector<1x128xf32>
    %102 = arith.addf %100, %101 : vector<1x128xf32>
    %103 = math.rsqrt %102 : vector<1x128xf32>
    %104 = vector.broadcast %103 : vector<1x128xf32> to vector<16x128xf32>
    %105 = arith.mulf %95, %104 : vector<16x128xf32>
    %106 = vector.broadcast %85 : vector<16x1xf32> to vector<16x128xf32>
    %107 = arith.mulf %105, %106 : vector<16x128xf32>
    %108 = vector.broadcast %86 : vector<16x1xf32> to vector<16x128xf32>
    %109 = arith.addf %107, %108 : vector<16x128xf32>
    %110 = arith.negf %109 : vector<16x128xf32>
    %111 = math.exp %110 : vector<16x128xf32>
    %cst_46 = arith.constant 1.000000e+00 : f32
    %112 = vector.broadcast %cst_46 : f32 to vector<16x128xf32>
    %113 = arith.addf %112, %111 : vector<16x128xf32>
    %114 = arith.divf %112, %113 : vector<16x128xf32>
    %115 = arith.mulf %109, %114 : vector<16x128xf32>
    %116 = arith.addf %115, %9 : vector<16x128xf32>
    %c64 = arith.constant 64 : index
    %c0_47 = arith.constant 0 : index
    %117 = vector.load %arg3[%c64, %c0_47] : memref<304x35xf32, #tpu.memory_space<vmem>>, vector<8x16xf32>
    %c64_48 = arith.constant 64 : index
    %c32_49 = arith.constant 32 : index
    %118 = vector.load %arg3[%c64_48, %c32_49] : memref<304x35xf32, #tpu.memory_space<vmem>>, vector<8x1xf32>
    %c64_50 = arith.constant 64 : index
    %c33_51 = arith.constant 33 : index
    %119 = vector.load %arg3[%c64_50, %c33_51] : memref<304x35xf32, #tpu.memory_space<vmem>>, vector<8x1xf32>
    %c64_52 = arith.constant 64 : index
    %c34_53 = arith.constant 34 : index
    %120 = vector.load %arg3[%c64_52, %c34_53] : memref<304x35xf32, #tpu.memory_space<vmem>>, vector<8x1xf32>
    %cst_54 = arith.constant dense<0.000000e+00> : vector<8x128xf32>
    %121 = tpu.matmul %117, %116, %cst_54 {dimension_numbers = #tpu.dot_dimension_numbers<[1], [0], [0], [1], [0, 0, 1, 1], [], []>} : vector<8x16xf32>, vector<16x128xf32>, vector<8x128xf32> -> vector<8x128xf32>
    %122 = vector.broadcast %118 : vector<8x1xf32> to vector<8x128xf32>
    %123 = arith.addf %121, %122 : vector<8x128xf32>
    %cst_55 = arith.constant dense<0.000000e+00> : vector<128xf32>
    %124 = vector.multi_reduction <add>, %123, %cst_55 [0] : vector<8x128xf32> to vector<128xf32>
    %125 = vector.shape_cast %124 : vector<128xf32> to vector<1x128xf32>
    %cst_56 = arith.constant 8.000000e+00 : f32
    %126 = vector.broadcast %cst_56 : f32 to vector<1x128xf32>
    %127 = arith.divf %125, %126 : vector<1x128xf32>
    %128 = vector.broadcast %127 : vector<1x128xf32> to vector<8x128xf32>
    %129 = arith.subf %123, %128 : vector<8x128xf32>
    %130 = arith.mulf %129, %129 : vector<8x128xf32>
    %cst_57 = arith.constant dense<0.000000e+00> : vector<128xf32>
    %131 = vector.multi_reduction <add>, %130, %cst_57 [0] : vector<8x128xf32> to vector<128xf32>
    %132 = vector.shape_cast %131 : vector<128xf32> to vector<1x128xf32>
    %cst_58 = arith.constant 8.000000e+00 : f32
    %133 = vector.broadcast %cst_58 : f32 to vector<1x128xf32>
    %134 = arith.divf %132, %133 : vector<1x128xf32>
    %cst_59 = arith.constant 9.99999974E-6 : f32
    %135 = vector.broadcast %cst_59 : f32 to vector<1x128xf32>
    %136 = arith.addf %134, %135 : vector<1x128xf32>
    %137 = math.rsqrt %136 : vector<1x128xf32>
    %138 = vector.broadcast %137 : vector<1x128xf32> to vector<8x128xf32>
    %139 = arith.mulf %129, %138 : vector<8x128xf32>
    %140 = vector.broadcast %119 : vector<8x1xf32> to vector<8x128xf32>
    %141 = arith.mulf %139, %140 : vector<8x128xf32>
    %142 = vector.broadcast %120 : vector<8x1xf32> to vector<8x128xf32>
    %143 = arith.addf %141, %142 : vector<8x128xf32>
    %144 = arith.negf %143 : vector<8x128xf32>
    %145 = math.exp %144 : vector<8x128xf32>
    %cst_60 = arith.constant 1.000000e+00 : f32
    %146 = vector.broadcast %cst_60 : f32 to vector<8x128xf32>
    %147 = arith.addf %146, %145 : vector<8x128xf32>
    %148 = arith.divf %146, %147 : vector<8x128xf32>
    %149 = arith.mulf %143, %148 : vector<8x128xf32>
    %150 = arith.addf %149, %10 : vector<8x128xf32>
    %c72 = arith.constant 72 : index
    %c0_61 = arith.constant 0 : index
    %151 = vector.load %arg3[%c72, %c0_61] : memref<304x35xf32, #tpu.memory_space<vmem>>, vector<8x8xf32>
    %c72_62 = arith.constant 72 : index
    %c32_63 = arith.constant 32 : index
    %152 = vector.load %arg3[%c72_62, %c32_63] : memref<304x35xf32, #tpu.memory_space<vmem>>, vector<8x1xf32>
    %c72_64 = arith.constant 72 : index
    %c33_65 = arith.constant 33 : index
    %153 = vector.load %arg3[%c72_64, %c33_65] : memref<304x35xf32, #tpu.memory_space<vmem>>, vector<8x1xf32>
    %c72_66 = arith.constant 72 : index
    %c34_67 = arith.constant 34 : index
    %154 = vector.load %arg3[%c72_66, %c34_67] : memref<304x35xf32, #tpu.memory_space<vmem>>, vector<8x1xf32>
    %cst_68 = arith.constant dense<0.000000e+00> : vector<8x128xf32>
    %155 = tpu.matmul %151, %150, %cst_68 {dimension_numbers = #tpu.dot_dimension_numbers<[1], [0], [0], [1], [0, 0, 1, 1], [], []>} : vector<8x8xf32>, vector<8x128xf32>, vector<8x128xf32> -> vector<8x128xf32>
    %156 = vector.broadcast %152 : vector<8x1xf32> to vector<8x128xf32>
    %157 = arith.addf %155, %156 : vector<8x128xf32>
    %cst_69 = arith.constant dense<0.000000e+00> : vector<128xf32>
    %158 = vector.multi_reduction <add>, %157, %cst_69 [0] : vector<8x128xf32> to vector<128xf32>
    %159 = vector.shape_cast %158 : vector<128xf32> to vector<1x128xf32>
    %cst_70 = arith.constant 8.000000e+00 : f32
    %160 = vector.broadcast %cst_70 : f32 to vector<1x128xf32>
    %161 = arith.divf %159, %160 : vector<1x128xf32>
    %162 = vector.broadcast %161 : vector<1x128xf32> to vector<8x128xf32>
    %163 = arith.subf %157, %162 : vector<8x128xf32>
    %164 = arith.mulf %163, %163 : vector<8x128xf32>
    %cst_71 = arith.constant dense<0.000000e+00> : vector<128xf32>
    %165 = vector.multi_reduction <add>, %164, %cst_71 [0] : vector<8x128xf32> to vector<128xf32>
    %166 = vector.shape_cast %165 : vector<128xf32> to vector<1x128xf32>
    %cst_72 = arith.constant 8.000000e+00 : f32
    %167 = vector.broadcast %cst_72 : f32 to vector<1x128xf32>
    %168 = arith.divf %166, %167 : vector<1x128xf32>
    %cst_73 = arith.constant 9.99999974E-6 : f32
    %169 = vector.broadcast %cst_73 : f32 to vector<1x128xf32>
    %170 = arith.addf %168, %169 : vector<1x128xf32>
    %171 = math.rsqrt %170 : vector<1x128xf32>
    %172 = vector.broadcast %171 : vector<1x128xf32> to vector<8x128xf32>
    %173 = arith.mulf %163, %172 : vector<8x128xf32>
    %174 = vector.broadcast %153 : vector<8x1xf32> to vector<8x128xf32>
    %175 = arith.mulf %173, %174 : vector<8x128xf32>
    %176 = vector.broadcast %154 : vector<8x1xf32> to vector<8x128xf32>
    %177 = arith.addf %175, %176 : vector<8x128xf32>
    %178 = arith.negf %177 : vector<8x128xf32>
    %179 = math.exp %178 : vector<8x128xf32>
    %cst_74 = arith.constant 1.000000e+00 : f32
    %180 = vector.broadcast %cst_74 : f32 to vector<8x128xf32>
    %181 = arith.addf %180, %179 : vector<8x128xf32>
    %182 = arith.divf %180, %181 : vector<8x128xf32>
    %183 = arith.mulf %177, %182 : vector<8x128xf32>
    %184 = arith.addf %183, %11 : vector<8x128xf32>
    %c80 = arith.constant 80 : index
    %c0_75 = arith.constant 0 : index
    %185 = vector.load %arg3[%c80, %c0_75] : memref<304x35xf32, #tpu.memory_space<vmem>>, vector<8x8xf32>
    %c80_76 = arith.constant 80 : index
    %c32_77 = arith.constant 32 : index
    %186 = vector.load %arg3[%c80_76, %c32_77] : memref<304x35xf32, #tpu.memory_space<vmem>>, vector<8x1xf32>
    %c80_78 = arith.constant 80 : index
    %c33_79 = arith.constant 33 : index
    %187 = vector.load %arg3[%c80_78, %c33_79] : memref<304x35xf32, #tpu.memory_space<vmem>>, vector<8x1xf32>
    %c80_80 = arith.constant 80 : index
    %c34_81 = arith.constant 34 : index
    %188 = vector.load %arg3[%c80_80, %c34_81] : memref<304x35xf32, #tpu.memory_space<vmem>>, vector<8x1xf32>
    %cst_82 = arith.constant dense<0.000000e+00> : vector<8x128xf32>
    %189 = tpu.matmul %185, %184, %cst_82 {dimension_numbers = #tpu.dot_dimension_numbers<[1], [0], [0], [1], [0, 0, 1, 1], [], []>} : vector<8x8xf32>, vector<8x128xf32>, vector<8x128xf32> -> vector<8x128xf32>
    %190 = vector.broadcast %186 : vector<8x1xf32> to vector<8x128xf32>
    %191 = arith.addf %189, %190 : vector<8x128xf32>
    %cst_83 = arith.constant dense<0.000000e+00> : vector<128xf32>
    %192 = vector.multi_reduction <add>, %191, %cst_83 [0] : vector<8x128xf32> to vector<128xf32>
    %193 = vector.shape_cast %192 : vector<128xf32> to vector<1x128xf32>
    %cst_84 = arith.constant 8.000000e+00 : f32
    %194 = vector.broadcast %cst_84 : f32 to vector<1x128xf32>
    %195 = arith.divf %193, %194 : vector<1x128xf32>
    %196 = vector.broadcast %195 : vector<1x128xf32> to vector<8x128xf32>
    %197 = arith.subf %191, %196 : vector<8x128xf32>
    %198 = arith.mulf %197, %197 : vector<8x128xf32>
    %cst_85 = arith.constant dense<0.000000e+00> : vector<128xf32>
    %199 = vector.multi_reduction <add>, %198, %cst_85 [0] : vector<8x128xf32> to vector<128xf32>
    %200 = vector.shape_cast %199 : vector<128xf32> to vector<1x128xf32>
    %cst_86 = arith.constant 8.000000e+00 : f32
    %201 = vector.broadcast %cst_86 : f32 to vector<1x128xf32>
    %202 = arith.divf %200, %201 : vector<1x128xf32>
    %cst_87 = arith.constant 9.99999974E-6 : f32
    %203 = vector.broadcast %cst_87 : f32 to vector<1x128xf32>
    %204 = arith.addf %202, %203 : vector<1x128xf32>
    %205 = math.rsqrt %204 : vector<1x128xf32>
    %206 = vector.broadcast %205 : vector<1x128xf32> to vector<8x128xf32>
    %207 = arith.mulf %197, %206 : vector<8x128xf32>
    %208 = vector.broadcast %187 : vector<8x1xf32> to vector<8x128xf32>
    %209 = arith.mulf %207, %208 : vector<8x128xf32>
    %210 = vector.broadcast %188 : vector<8x1xf32> to vector<8x128xf32>
    %211 = arith.addf %209, %210 : vector<8x128xf32>
    %212 = arith.negf %211 : vector<8x128xf32>
    %213 = math.exp %212 : vector<8x128xf32>
    %cst_88 = arith.constant 1.000000e+00 : f32
    %214 = vector.broadcast %cst_88 : f32 to vector<8x128xf32>
    %215 = arith.addf %214, %213 : vector<8x128xf32>
    %216 = arith.divf %214, %215 : vector<8x128xf32>
    %217 = arith.mulf %211, %216 : vector<8x128xf32>
    %218 = arith.addf %217, %149 : vector<8x128xf32>
    %219 = arith.addf %218, %12 : vector<8x128xf32>
    %c88 = arith.constant 88 : index
    %c0_89 = arith.constant 0 : index
    %220 = vector.load %arg3[%c88, %c0_89] : memref<304x35xf32, #tpu.memory_space<vmem>>, vector<16x8xf32>
    %c88_90 = arith.constant 88 : index
    %c32_91 = arith.constant 32 : index
    %221 = vector.load %arg3[%c88_90, %c32_91] : memref<304x35xf32, #tpu.memory_space<vmem>>, vector<16x1xf32>
    %c88_92 = arith.constant 88 : index
    %c33_93 = arith.constant 33 : index
    %222 = vector.load %arg3[%c88_92, %c33_93] : memref<304x35xf32, #tpu.memory_space<vmem>>, vector<16x1xf32>
    %c88_94 = arith.constant 88 : index
    %c34_95 = arith.constant 34 : index
    %223 = vector.load %arg3[%c88_94, %c34_95] : memref<304x35xf32, #tpu.memory_space<vmem>>, vector<16x1xf32>
    %cst_96 = arith.constant dense<0.000000e+00> : vector<16x128xf32>
    %224 = tpu.matmul %220, %219, %cst_96 {dimension_numbers = #tpu.dot_dimension_numbers<[1], [0], [0], [1], [0, 0, 1, 1], [], []>} : vector<16x8xf32>, vector<8x128xf32>, vector<16x128xf32> -> vector<16x128xf32>
    %225 = vector.broadcast %221 : vector<16x1xf32> to vector<16x128xf32>
    %226 = arith.addf %224, %225 : vector<16x128xf32>
    %cst_97 = arith.constant dense<0.000000e+00> : vector<128xf32>
    %227 = vector.multi_reduction <add>, %226, %cst_97 [0] : vector<16x128xf32> to vector<128xf32>
    %228 = vector.shape_cast %227 : vector<128xf32> to vector<1x128xf32>
    %cst_98 = arith.constant 1.600000e+01 : f32
    %229 = vector.broadcast %cst_98 : f32 to vector<1x128xf32>
    %230 = arith.divf %228, %229 : vector<1x128xf32>
    %231 = vector.broadcast %230 : vector<1x128xf32> to vector<16x128xf32>
    %232 = arith.subf %226, %231 : vector<16x128xf32>
    %233 = arith.mulf %232, %232 : vector<16x128xf32>
    %cst_99 = arith.constant dense<0.000000e+00> : vector<128xf32>
    %234 = vector.multi_reduction <add>, %233, %cst_99 [0] : vector<16x128xf32> to vector<128xf32>
    %235 = vector.shape_cast %234 : vector<128xf32> to vector<1x128xf32>
    %cst_100 = arith.constant 1.600000e+01 : f32
    %236 = vector.broadcast %cst_100 : f32 to vector<1x128xf32>
    %237 = arith.divf %235, %236 : vector<1x128xf32>
    %cst_101 = arith.constant 9.99999974E-6 : f32
    %238 = vector.broadcast %cst_101 : f32 to vector<1x128xf32>
    %239 = arith.addf %237, %238 : vector<1x128xf32>
    %240 = math.rsqrt %239 : vector<1x128xf32>
    %241 = vector.broadcast %240 : vector<1x128xf32> to vector<16x128xf32>
    %242 = arith.mulf %232, %241 : vector<16x128xf32>
    %243 = vector.broadcast %222 : vector<16x1xf32> to vector<16x128xf32>
    %244 = arith.mulf %242, %243 : vector<16x128xf32>
    %245 = vector.broadcast %223 : vector<16x1xf32> to vector<16x128xf32>
    %246 = arith.addf %244, %245 : vector<16x128xf32>
    %247 = arith.negf %246 : vector<16x128xf32>
    %248 = math.exp %247 : vector<16x128xf32>
    %cst_102 = arith.constant 1.000000e+00 : f32
    %249 = vector.broadcast %cst_102 : f32 to vector<16x128xf32>
    %250 = arith.addf %249, %248 : vector<16x128xf32>
    %251 = arith.divf %249, %250 : vector<16x128xf32>
    %252 = arith.mulf %246, %251 : vector<16x128xf32>
    %253 = arith.addf %252, %115 : vector<16x128xf32>
    %254 = arith.addf %253, %13 : vector<16x128xf32>
    %c104 = arith.constant 104 : index
    %c0_103 = arith.constant 0 : index
    %255 = vector.load %arg3[%c104, %c0_103] : memref<304x35xf32, #tpu.memory_space<vmem>>, vector<16x16xf32>
    %c104_104 = arith.constant 104 : index
    %c32_105 = arith.constant 32 : index
    %256 = vector.load %arg3[%c104_104, %c32_105] : memref<304x35xf32, #tpu.memory_space<vmem>>, vector<16x1xf32>
    %c104_106 = arith.constant 104 : index
    %c33_107 = arith.constant 33 : index
    %257 = vector.load %arg3[%c104_106, %c33_107] : memref<304x35xf32, #tpu.memory_space<vmem>>, vector<16x1xf32>
    %c104_108 = arith.constant 104 : index
    %c34_109 = arith.constant 34 : index
    %258 = vector.load %arg3[%c104_108, %c34_109] : memref<304x35xf32, #tpu.memory_space<vmem>>, vector<16x1xf32>
    %cst_110 = arith.constant dense<0.000000e+00> : vector<16x128xf32>
    %259 = tpu.matmul %255, %254, %cst_110 {dimension_numbers = #tpu.dot_dimension_numbers<[1], [0], [0], [1], [0, 0, 1, 1], [], []>} : vector<16x16xf32>, vector<16x128xf32>, vector<16x128xf32> -> vector<16x128xf32>
    %260 = vector.broadcast %256 : vector<16x1xf32> to vector<16x128xf32>
    %261 = arith.addf %259, %260 : vector<16x128xf32>
    %cst_111 = arith.constant dense<0.000000e+00> : vector<128xf32>
    %262 = vector.multi_reduction <add>, %261, %cst_111 [0] : vector<16x128xf32> to vector<128xf32>
    %263 = vector.shape_cast %262 : vector<128xf32> to vector<1x128xf32>
    %cst_112 = arith.constant 1.600000e+01 : f32
    %264 = vector.broadcast %cst_112 : f32 to vector<1x128xf32>
    %265 = arith.divf %263, %264 : vector<1x128xf32>
    %266 = vector.broadcast %265 : vector<1x128xf32> to vector<16x128xf32>
    %267 = arith.subf %261, %266 : vector<16x128xf32>
    %268 = arith.mulf %267, %267 : vector<16x128xf32>
    %cst_113 = arith.constant dense<0.000000e+00> : vector<128xf32>
    %269 = vector.multi_reduction <add>, %268, %cst_113 [0] : vector<16x128xf32> to vector<128xf32>
    %270 = vector.shape_cast %269 : vector<128xf32> to vector<1x128xf32>
    %cst_114 = arith.constant 1.600000e+01 : f32
    %271 = vector.broadcast %cst_114 : f32 to vector<1x128xf32>
    %272 = arith.divf %270, %271 : vector<1x128xf32>
    %cst_115 = arith.constant 9.99999974E-6 : f32
    %273 = vector.broadcast %cst_115 : f32 to vector<1x128xf32>
    %274 = arith.addf %272, %273 : vector<1x128xf32>
    %275 = math.rsqrt %274 : vector<1x128xf32>
    %276 = vector.broadcast %275 : vector<1x128xf32> to vector<16x128xf32>
    %277 = arith.mulf %267, %276 : vector<16x128xf32>
    %278 = vector.broadcast %257 : vector<16x1xf32> to vector<16x128xf32>
    %279 = arith.mulf %277, %278 : vector<16x128xf32>
    %280 = vector.broadcast %258 : vector<16x1xf32> to vector<16x128xf32>
    %281 = arith.addf %279, %280 : vector<16x128xf32>
    %282 = arith.negf %281 : vector<16x128xf32>
    %283 = math.exp %282 : vector<16x128xf32>
    %cst_116 = arith.constant 1.000000e+00 : f32
    %284 = vector.broadcast %cst_116 : f32 to vector<16x128xf32>
    %285 = arith.addf %284, %283 : vector<16x128xf32>
    %286 = arith.divf %284, %285 : vector<16x128xf32>
    %287 = arith.mulf %281, %286 : vector<16x128xf32>
    %288 = arith.addf %287, %81 : vector<16x128xf32>
    %289 = arith.addf %288, %14 : vector<16x128xf32>
    %c120 = arith.constant 120 : index
    %c0_117 = arith.constant 0 : index
    %290 = vector.load %arg3[%c120, %c0_117] : memref<304x35xf32, #tpu.memory_space<vmem>>, vector<32x16xf32>
    %c120_118 = arith.constant 120 : index
    %c32_119 = arith.constant 32 : index
    %291 = vector.load %arg3[%c120_118, %c32_119] : memref<304x35xf32, #tpu.memory_space<vmem>>, vector<32x1xf32>
    %c120_120 = arith.constant 120 : index
    %c33_121 = arith.constant 33 : index
    %292 = vector.load %arg3[%c120_120, %c33_121] : memref<304x35xf32, #tpu.memory_space<vmem>>, vector<32x1xf32>
    %c120_122 = arith.constant 120 : index
    %c34_123 = arith.constant 34 : index
    %293 = vector.load %arg3[%c120_122, %c34_123] : memref<304x35xf32, #tpu.memory_space<vmem>>, vector<32x1xf32>
    %cst_124 = arith.constant dense<0.000000e+00> : vector<32x128xf32>
    %294 = tpu.matmul %290, %289, %cst_124 {dimension_numbers = #tpu.dot_dimension_numbers<[1], [0], [0], [1], [0, 0, 1, 1], [], []>} : vector<32x16xf32>, vector<16x128xf32>, vector<32x128xf32> -> vector<32x128xf32>
    %295 = vector.broadcast %291 : vector<32x1xf32> to vector<32x128xf32>
    %296 = arith.addf %294, %295 : vector<32x128xf32>
    %cst_125 = arith.constant dense<0.000000e+00> : vector<128xf32>
    %297 = vector.multi_reduction <add>, %296, %cst_125 [0] : vector<32x128xf32> to vector<128xf32>
    %298 = vector.shape_cast %297 : vector<128xf32> to vector<1x128xf32>
    %cst_126 = arith.constant 3.200000e+01 : f32
    %299 = vector.broadcast %cst_126 : f32 to vector<1x128xf32>
    %300 = arith.divf %298, %299 : vector<1x128xf32>
    %301 = vector.broadcast %300 : vector<1x128xf32> to vector<32x128xf32>
    %302 = arith.subf %296, %301 : vector<32x128xf32>
    %303 = arith.mulf %302, %302 : vector<32x128xf32>
    %cst_127 = arith.constant dense<0.000000e+00> : vector<128xf32>
    %304 = vector.multi_reduction <add>, %303, %cst_127 [0] : vector<32x128xf32> to vector<128xf32>
    %305 = vector.shape_cast %304 : vector<128xf32> to vector<1x128xf32>
    %cst_128 = arith.constant 3.200000e+01 : f32
    %306 = vector.broadcast %cst_128 : f32 to vector<1x128xf32>
    %307 = arith.divf %305, %306 : vector<1x128xf32>
    %cst_129 = arith.constant 9.99999974E-6 : f32
    %308 = vector.broadcast %cst_129 : f32 to vector<1x128xf32>
    %309 = arith.addf %307, %308 : vector<1x128xf32>
    %310 = math.rsqrt %309 : vector<1x128xf32>
    %311 = vector.broadcast %310 : vector<1x128xf32> to vector<32x128xf32>
    %312 = arith.mulf %302, %311 : vector<32x128xf32>
    %313 = vector.broadcast %292 : vector<32x1xf32> to vector<32x128xf32>
    %314 = arith.mulf %312, %313 : vector<32x128xf32>
    %315 = vector.broadcast %293 : vector<32x1xf32> to vector<32x128xf32>
    %316 = arith.addf %314, %315 : vector<32x128xf32>
    %317 = arith.negf %316 : vector<32x128xf32>
    %318 = math.exp %317 : vector<32x128xf32>
    %cst_130 = arith.constant 1.000000e+00 : f32
    %319 = vector.broadcast %cst_130 : f32 to vector<32x128xf32>
    %320 = arith.addf %319, %318 : vector<32x128xf32>
    %321 = arith.divf %319, %320 : vector<32x128xf32>
    %322 = arith.mulf %316, %321 : vector<32x128xf32>
    %323 = arith.addf %322, %47 : vector<32x128xf32>
    %c152 = arith.constant 152 : index
    %c0_131 = arith.constant 0 : index
    %324 = vector.load %arg3[%c152, %c0_131] : memref<304x35xf32, #tpu.memory_space<vmem>>, vector<32x32xf32>
    %c152_132 = arith.constant 152 : index
    %c32_133 = arith.constant 32 : index
    %325 = vector.load %arg3[%c152_132, %c32_133] : memref<304x35xf32, #tpu.memory_space<vmem>>, vector<32x1xf32>
    %cst_134 = arith.constant dense<0.000000e+00> : vector<32x128xf32>
    %326 = tpu.matmul %324, %323, %cst_134 {dimension_numbers = #tpu.dot_dimension_numbers<[1], [0], [0], [1], [0, 0, 1, 1], [], []>} : vector<32x32xf32>, vector<32x128xf32>, vector<32x128xf32> -> vector<32x128xf32>
    %327 = vector.broadcast %325 : vector<32x1xf32> to vector<32x128xf32>
    %328 = arith.addf %326, %327 : vector<32x128xf32>
    %c0_135 = arith.constant 0 : index
    %c0_136 = arith.constant 0 : index
    %329 = vector.load %arg4[%c0_135, %c0_136] : memref<32x128xf32, #tpu.memory_space<vmem>>, vector<32x128xf32>
    tpu.vector_store %arg4[%c0_135, %c0_136], %328 {strides = array<i32>} : memref<32x128xf32, #tpu.memory_space<vmem>>, vector<32x128xf32>,
    return
  }
  func.func @transform_0(%arg0: i32) -> (i32, i32) {
    %c0_i32 = arith.constant 0 : i32
    %c0_i32_0 = arith.constant 0 : i32
    return %c0_i32, %arg0 : i32, i32
  }
  func.func @transform_1(%arg0: i32) -> (i32, i32) {
    %c0_i32 = arith.constant 0 : i32
    %c0_i32_0 = arith.constant 0 : i32
    return %c0_i32, %arg0 : i32, i32
  }
  func.func @transform_2(%arg0: i32) -> (i32, i32) {
    %c0_i32 = arith.constant 0 : i32
    %c0_i32_0 = arith.constant 0 : i32
    %c0_i32_1 = arith.constant 0 : i32
    return %c0_i32, %c0_i32_0 : i32, i32
  }
  func.func @transform_3(%arg0: i32) -> (i32, i32) {
    %c0_i32 = arith.constant 0 : i32
    %c0_i32_0 = arith.constant 0 : i32
    return %c0_i32, %arg0 : i32, i32
  }
}

</mosaic_0001>

<bundles_post_ra>
// kernel: tpu_custom_call.1
= control target key start
LH: loop header
LB: loop body
LE: loop exit
PB: predicated region body
PF: predicated region fallthrough
CT: control target
= control target key end

     0   :  { %v1820_v3 = vmov 32   ;;  %vm111_vm0 = vcmask 130048   ;;  %s2355_s0 = inlined_call_operand.vmem [shape: f32[32,128], index: 0, kind: input, shape index: {}]   ;;  %s2356_s1 = inlined_call_operand.vmem [shape: f32[16,128], index: 1, kind: input, shape index: {}]   ;;  %s2357_s2 = inlined_call_operand.vmem [shape: f32[304,35], index: 2, kind: input, shape index: {}]   ;;  %s2358_s3 = inlined_call_operand.hbm [shape: f32[32,128], index: 3, kind: output, shape index: {}]  }
   0x1   :  { %v20_v0 = vld [vmem:[%s2356_s1 + $0x8] sm:$0xff]  ;;  %v206_v1 = vld [vmem:[%s2357_s2 + $0x10] sm:$0xff]  ;;  %v19_v2 = vld [vmem:[%s2356_s1] sm:$0xff]  ;;  %1639 = vset.pattern.permute.xlu1 %v1820_v3  ;;  %1638 = vset.pattern.permute.xlu0 %v1820_v3 }
   0x2   :  { %1625 = vmatpush.msra.mxu1 %v20_v0  ;;  %v1862_v4 = vld [vmem:[%s2357_s2 + $0x108] sm:$0xff]  ;;  %220 = vperm.xlu1 %1639, %v206_v1   ;;  %v18_v5 = vld [vmem:[%s2355_s0 + $0x18] sm:$0xff]  ;;  %v204_v6 = vld [vmem:[%s2357_s2] sm:$0xff] }
   0x3   :  { %156 = vmatpush.msra.mxu0 %v20_v0  ;;  %v17_v7 = vld [vmem:[%s2355_s0 + $0x10] sm:$0xff]  ;;  %210 = vperm.xlu0 %1638, %v204_v6  }
   0x4   :  { %1627 = vmatpush.msra.mxu1 %v19_v2 }
   0x5   :  { %1578 = vmatmul.msk.f32.vlgmr.msra.gmra.mxu1 %vm111_vm0, %v1862_v4 }
   0x6   :  { %8 = vsyncpa [#allocation3], 0  ;;  %249 = vmatpush.msrb.mxu1 %v18_v5  ;;  %v21_v8 = vld [vmem:[%s2357_s2 + $0xb8] sm:$0xff]  ;;  %157 = vmatpush.msra.mxu0 %v19_v2  ;;  %v16_v9 = vld [vmem:[%s2355_s0 + $0x8] sm:$0xff]  ;;  %v1821_v11 = vmov 33   ;;  %vm228_vm1 = vcmask 261120  }
   0x7   :  { %v207_v10 = vld [vmem:[%s2357_s2 + $0x18] sm:$0xff]  ;;  %1568 = vmatmul.msk.f32.vlgmr.msra.gmra.mxu0 %vm111_vm0, %v21_v8  ;;  %1640 = vset.pattern.permute.xlu2 %v1821_v11  ;;  %v15_v12 = vld [vmem:[%s2355_s0] sm:$0xff]  ;;  %v205_v13 = vld [vmem:[%s2357_s2 + $0x8] sm:$0xff]  ;;  %v1822_v14 = vmov 34   ;;  %v1823_v32 = vmov 32.0   ;;  %s1556_s20 = sshll.u32 %s2358_s3, 4  ;;  %s1557_s20 = int_to_ptr.hbm [resolvable:$true] %s1556_s20 }
   0x8   :  { %250 = vmatpush.msrb.mxu1 %v17_v7  ;;  %329 = vperm.xlu2 %1640, %v207_v10   ;;  %v24_v15 = vld [vmem:[%s2357_s2 + $0xd0] sm:$0xff]  ;;  %v1909_v16 = vld [vmem:[%s2357_s2 + $0x28] sm:$0xff]  ;;  %v1917_v17 = vld [vmem:[%s2357_s2 + $0xe0] sm:$0xff]  ;;  %1692 = vrcp.f32 %v1823_v32  ;;  %s1827_s21 = smov 128   ;;  %s1828_s22 = smov 8  }
   0x9   :  { %1626 = vmatpush.msra.mxu3 %v20_v0  ;;  %v1924_v18 = vld [vmem:[%s2357_s2 + $0x38] sm:$0xff]  ;;  %v22_v19 = vld [vmem:[%s2357_s2 + $0xc0] sm:$0xff]  ;;  %v1934_v20 = vld [vmem:[%s2357_s2 + $0x30] sm:$0xff] }
   0xa   :  { %251 = vmatpush.msrb.mxu1 %v16_v9  ;;  %225 = vperm.xlu1 %1639, %v207_v10   ;;  %v23_v21 = vld [vmem:[%s2357_s2 + $0xc8] sm:$0xff]  ;;  %v1946_v22 = vld [vmem:[%s2357_s2 + $0xf0] sm:$0xff]  ;;  %v1954_v23 = vld [vmem:[%s2357_s2 + $0x40] sm:$0xff] }
   0xb   :  { %1628 = vmatpush.msra.mxu3 %v19_v2  ;;  %215 = vperm.xlu0 %1638, %v205_v13   ;;  %v1960_v24 = vld [vmem:[%s2357_s2 + $0xf8] sm:$0xff]  ;;  %v1966_v25 = vld [vmem:[%s2357_s2 + $0x48] sm:$0xff]  ;;  %v1973_v26 = vld [vmem:[%s2357_s2 + $0x50] sm:$0xff] }
   0xc   :  { %252 = vmatpush.msrb.mxu1 %v15_v12  ;;  %v1982_v28 = vld [vmem:[%s2357_s2 + $0x20] sm:$0xff] }
   0xd   :  { %1583 = vmatmul.msk.f32.vlgmr.msrb.gmra.mxu1 %vm228_vm1, %v204_v6 }
   0xe   :  { %v1693_v36 = vpop.eup %1692 }
   0xf   :  { %1569 = vmatmul.msk.f32.gmra.mxu0 %vm111_vm0, %v22_v19  ;;  %v276_v40 = vmul.f32 32.0, %v1693_v36  ;;  %vm280_vm2 = vweird.f32 %v1693_v36 }
  0x10   :  { %325 = vperm.xlu2 %1640, %v206_v1  }
  0x11   :  { %v277_v46 = vsub.f32 1.0, %v276_v40 }
  0x12   :  { %1642 = vset.pattern.permute.xlu1 %v1821_v11 }
  0x13   :  { %321 = vperm.xlu1 %1642, %v205_v13   ;;  %1641 = vset.pattern.permute.xlu0 %v1822_v14  ;;  %v278_v49 = vmul.f32 %v1693_v36, %v277_v46 }
  0x14   :  { %349 = vperm.xlu0 %1641, %v207_v10  }
  0x15   :  { %1584 = vmatmul.msk.f32.gmra.mxu1 %vm228_vm1, %v205_v13  ;;  %v279_v52 = vadd.f32 %v1693_v36, %v278_v49 }
  0x17   :  { %1570 = vmatmul.msk.f32.gmra.mxu0 %vm111_vm0, %v23_v21  ;;  %v1999_v55 = vsel %vm280_vm2, %v1693_v36, %v279_v52 }
  0x18   :  { %1643 = vset.pattern.permute.xlu2 %v1822_v14 }
  0x19   :  { %345 = vperm.xlu2 %1643, %v206_v1  }
  0x1b   :  { %317 = vperm.xlu1 %1642, %v204_v6  }
  0x1c   :  { %337 = vperm.xlu0 %1641, %v204_v6  }
  0x1d   :  { %1585 = vmatmul.msk.f32.gmra.mxu1 %vm228_vm1, %v206_v1 }
  0x1f   :  { %1571 = vmatmul.msk.f32.gmra.mxu0 %vm111_vm0, %v24_v15 }
  0x21   :  { %341 = vperm.xlu2 %1643, %v205_v13  }
  0x23   :  { %1644 = vset.pattern.permute.xlu1 %v1820_v3 }
  0x24   :  { %53 = vperm.xlu1 %1644, %v24_v15   ;;  %1646 = vset.pattern.permute.xlu0 %v1820_v3 }
  0x25   :  { %1586 = vmatmul.msk.f32.gmra.mxu1 %vm228_vm1, %v207_v10  ;;  %43 = vperm.xlu0 %1646, %v22_v19  }
  0x29   :  { %1645 = vset.pattern.permute.xlu2 %v1820_v3 }
  0x2a   :  { %48 = vperm.xlu2 %1645, %v23_v21  }
  0x2c   :  { %38 = vperm.xlu1 %1644, %v21_v8  }
  0x2d   :  { %1648 = vset.pattern.permute.xlu0 %v1821_v11 }
  0x2e   :  { %520 = vperm.xlu0 %1648, %v1982_v28  }
  0x32   :  { %444 = vperm.xlu2 %1645, %v1982_v28  }
  0x34   :  { %449 = vperm.xlu1 %1644, %v1909_v16  }
  0x36   :  { %1653 = vset.pattern.permute.xlu0 %v1820_v3 }
  0x37   :  { %585 = vperm.xlu0 %1653, %v1934_v20  }
  0x3a   :  { %1647 = vset.pattern.permute.xlu2 %v1821_v11 }
  0x3b   :  { %524 = vperm.xlu2 %1647, %v1909_v16  }
  0x3c   :  { %1649 = vset.pattern.permute.xlu1 %v1822_v14 }
  0x3d   :  { %534 = vperm.xlu1 %1649, %v1909_v16  }
  0x3f   :  { %1657 = vset.pattern.permute.xlu0 %v1822_v14 }
  0x40   :  { %664 = vperm.xlu0 %1657, %v1934_v20  }
  0x43   :  { %1650 = vset.pattern.permute.xlu2 %v1822_v14 }
  0x44   :  { %530 = vperm.xlu2 %1650, %v1982_v28  }
  0x45   :  { %1651 = vset.pattern.permute.xlu1 %v1820_v3 }
  0x46   :  { %63 = vperm.xlu1 %1651, %v1917_v17  }
  0x48   :  { %784 = vperm.xlu0 %1657, %v1954_v23  }
  0x4c   :  { %1652 = vset.pattern.permute.xlu2 %v1820_v3 }
  0x4e   :  { %590 = vperm.xlu1 %1651, %v1924_v18  }
  0x50   :  { %1662 = vset.pattern.permute.xlu0 %v1821_v11 }
  0x51   :  { %867 = vperm.xlu0 %1662, %v1966_v25  }
  0x56   :  { %1655 = vset.pattern.permute.xlu1 %v1821_v11 }
  0x57   :  { %654 = vperm.xlu1 %1655, %v1934_v20  }
  0x59   :  { %1666 = vset.pattern.permute.xlu0 %v1822_v14 }
  0x5a   :  { %959 = vperm.xlu0 %1666, %v1973_v26  }
  0x5f   :  { %1658 = vset.pattern.permute.xlu1 %v1820_v3 }
  0x60   :  { %73 = vperm.xlu1 %1658, %v1946_v22  }
  0x62   :  { %1669 = vset.pattern.permute.xlu0 %v1821_v11  ;;  %v330_v10 = vpop.permute.xlu2 %329 }
  0x68   :  { %718 = vperm.xlu1 %1658, %v1954_v23  }
  0x6a   :  { %v326_v21 = vpop.permute.xlu2 %325 }
  0x70   :  { %78 = vperm.xlu1 %1658, %v1960_v24  }
  0x74   :  { %v221_v33 = vpop.permute.xlu1 %220 }
  0x75   :  { %v211_v30 = vpop.permute.xlu0 %210 }
  0x78   :  { %1663 = vset.pattern.permute.xlu1 %v1822_v14 }
  0x79   :  { %872 = vperm.xlu1 %1663, %v1966_v25  }
  0x7c   :  { %v226_v42 = vpop.permute.xlu1 %225 }
  0x7d   :  { %v216_v34 = vpop.permute.xlu0 %215 }
  0x81   :  { %1664 = vset.pattern.permute.xlu1 %v1820_v3 }
  0x82   :  { %v1976_v27 = vpop.f32.mrf.mxu1  ;;  %900 = vperm.xlu1 %1664, %v1973_v26  }
  0x86   :  { %v350_v36 = vpop.permute.xlu0 %349 }
  0x8a   :  { %v254_v29 = vpop.f32.mrf.mxu1  ;;  %88 = vperm.xlu1 %1664, %v1862_v4  }
  0x8b   :  { %v255_v38 = vadd.f32 %v254_v29, %v211_v30 }
  0x92   :  { %v257_v31 = vpop.f32.mrf.mxu1 }
  0x93   :  { %v258_v37 = vadd.f32 %v257_v31, %v216_v34  ;;  %v322_v31 = vpop.permute.xlu1 %321 }
  0x95   :  { %v266_v41 = vadd.f32 %v258_v37, %v255_v38 }
  0x9a   :  { %v260_v35 = vpop.f32.mrf.mxu1 }
  0x9b   :  { %v261_v39 = vadd.f32 %v260_v35, %v221_v33  ;;  %v2006_v33 = vpop.f32.mrf.mxu0  ;;  %v346_v35 = vpop.permute.xlu2 %345 }
  0x9d   :  { %v267_v44 = vadd.f32 %v266_v41, %v261_v39 }
  0xa2   :  { %v263_v43 = vpop.f32.mrf.mxu1 }
  0xa3   :  { %v264_v45 = vadd.f32 %v263_v43, %v226_v42  ;;  %v2008_v49 = vpop.f32.mrf.mxu0 }
  0xa5   :  { %v268_v47 = vadd.f32 %v267_v44, %v264_v45  ;;  %v318_v44 = vpop.permute.xlu1 %317 }
  0xa7   :  { %v269_v48 = vrot.slane %v268_v47, 4 }
  0xa9   :  { %v270_v50 = vadd.f32 %v269_v48, %v268_v47 }
  0xab   :  { %v271_v51 = vrot.slane %v270_v50, 2 }
  0xad   :  { %v272_v53 = vadd.f32 %v271_v51, %v270_v50  ;;  %v342_v50 = vpop.permute.xlu2 %341  ;;  %v338_v51 = vpop.permute.xlu0 %337 }
  0xaf   :  { %v273_v54 = vrot.slane %v272_v53, 1 }
  0xb1   :  { %v274_v56 = vadd.f32 %v273_v54, %v272_v53 }
  0xb3   :  { %v282_v57 = vmul.f32 %v1999_v55, %v274_v56 }
  0xb5   :  { %v283_v58 = vsub.f32 %v255_v38, %v282_v57  ;;  %v284_v59 = vsub.f32 %v258_v37, %v282_v57  ;;  %v285_v60 = vsub.f32 %v261_v39, %v282_v57  ;;  %v286_v61 = vsub.f32 %v264_v45, %v282_v57 }
  0xb7   :  { %v287_v62 = vmul.f32 %v283_v58, %v283_v58  ;;  %v288_v63 = vmul.f32 %v284_v59, %v284_v59  ;;  %v289_v0 = vmul.f32 %v285_v60, %v285_v60  ;;  %v290_v2 = vmul.f32 %v286_v61, %v286_v61 }
  0xb9   :  { %v291_v1 = vadd.f32 %v288_v63, %v287_v62 }
  0xbb   :  { %v292_v4 = vadd.f32 %v291_v1, %v289_v0 }
  0xbd   :  { %v293_v5 = vadd.f32 %v292_v4, %v290_v2 }
  0xbf   :  { %v294_v6 = vrot.slane %v293_v5, 4 }
  0xc1   :  { %v295_v7 = vadd.f32 %v294_v6, %v293_v5 }
  0xc3   :  { %v296_v8 = vrot.slane %v295_v7, 2 }
  0xc5   :  { %v297_v9 = vadd.f32 %v296_v8, %v295_v7 }
  0xc7   :  { %v298_v12 = vrot.slane %v297_v9, 1 }
  0xc9   :  { %v299_v13 = vadd.f32 %v298_v12, %v297_v9 }
  0xcb   :  { %v300_v15 = vmul.f32 %v299_v13, %v1999_v55 }
  0xcd   :  { %v301_v19 = vadd.f32 1e-05, %v300_v15  ;;  %v54_v15 = vpop.permute.xlu1 %53 }
  0xcf   :  { %1694 = vrsqrt.f32 %v301_v19  ;;  %vm308_vm4 = vweird.f32 %v301_v19 }
  0xd5   :  { %v1695_v29 = vpop.eup %1694 }
  0xd6   :  { %v303_v30 = vmul.f32 %v1695_v29, %v301_v19  ;;  %vm309_vm3 = vweird.f32 %v1695_v29 }
  0xd7   :  { %vm310_vm5 = vmor %vm308_vm4, %vm309_vm3 }
  0xd8   :  { %v304_v32 = vmul.f32 %v1695_v29, %v303_v30 }
  0xda   :  { %v305_v34 = vmul.f32 0.5, %v304_v32 }
  0xdc   :  { %v306_v37 = vsub.f32 1.5, %v305_v34 }
  0xde   :  { %v307_v38 = vmul.f32 %v1695_v29, %v306_v37 }
  0xe0   :  { %v311_v39 = vsel %vm310_vm5, %v1695_v29, %v307_v38 }
  0xe1   :  { %v315_v40 = vmul.f32 %v311_v39, %v286_v61  ;;  %v314_v41 = vmul.f32 %v311_v39, %v285_v60  ;;  %v313_v42 = vmul.f32 %v311_v39, %v284_v59  ;;  %v312_v43 = vmul.f32 %v311_v39, %v283_v58  ;;  %v2022_v61 = vpop.f32.mrf.mxu0 }
  0xe3   :  { %v335_v45 = vmul.f32 %v330_v10, %v315_v40  ;;  %v334_v46 = vmul.f32 %v326_v21, %v314_v41  ;;  %v333_v47 = vmul.f32 %v322_v31, %v313_v42  ;;  %v332_v48 = vmul.f32 %v318_v44, %v312_v43  ;;  %v25_v10 = vld [vmem:[%s2357_s2 + $0xd8] sm:$0xff] }
  0xe4   :  { %1572 = vmatmul.msk.f32.gmra.mxu0 %vm111_vm0, %v25_v10  ;;  %58 = vperm.xlu2 %1652, %v25_v10  }
  0xe5   :  { %v2010_v52 = vadd.f32 %v346_v35, %v334_v46  ;;  %v2012_v53 = vadd.f32 %v350_v36, %v335_v45  ;;  %v2014_v54 = vadd.f32 %v342_v50, %v333_v47  ;;  %v2016_v56 = vadd.f32 %v338_v51, %v332_v48 }
  0xe7   :  { %v1589_v57 = vmul.f32 -1.442695, %v2010_v52  ;;  %v1590_v58 = vmul.f32 -1.442695, %v2012_v53  ;;  %v1588_v59 = vmul.f32 -1.442695, %v2014_v54 }
  0xe8   :  { %v1587_v60 = vmul.f32 -1.442695, %v2016_v56 }
  0xe9   :  { %1696 = vpow2.f32 %v1589_v57  ;;  %v168_v9 = vpop.f32.mrf.mxu0 }
  0xea   :  { %1698 = vpow2.f32 %v1590_v58  ;;  %v169_v21 = vadd.f32 %v168_v9, %v54_v15 }
  0xeb   :  { %1700 = vpow2.f32 %v1588_v59 }
  0xec   :  { %1702 = vpow2.f32 %v1587_v60  ;;  %1573 = vmatmul.msk.f32.gmra.mxu0 %vm111_vm0, %v1917_v17  ;;  %1654 = vset.pattern.permute.xlu2 %v1821_v11 }
  0xed   :  { %658 = vperm.xlu2 %1654, %v1924_v18  }
  0xef   :  { %v1697_v62 = vpop.eup %1696 }
  0xf0   :  { %v1699_v63 = vpop.eup %1698  ;;  %v370_v0 = vadd.f32 1.0, %v1697_v62 }
  0xf1   :  { %v1701_v1 = vpop.eup %1700  ;;  %v371_v2 = vadd.f32 1.0, %v1699_v63 }
  0xf2   :  { %v1703_v4 = vpop.eup %1702  ;;  %1704 = vrcp.f32 %v370_v0  ;;  %v369_v5 = vadd.f32 1.0, %v1701_v1  ;;  %v411_v7 = vand.u32 2147483647, %v370_v0  ;;  %v413_v8 = vand.u32 2147483648, %v370_v0 }
  0xf3   :  { %1706 = vrcp.f32 %v371_v2  ;;  %v2024_v6 = vadd.f32 1.0, %v1703_v4  ;;  %vm407_vm6 = vweird.f32 %v370_v0  ;;  %vm422_vm7 = vweird.f32 %v371_v2  ;;  %v49_v4 = vpop.permute.xlu2 %48 }
  0xf4   :  { %1708 = vrcp.f32 %v369_v5  ;;  %vm2031_vm8 = vcmp.eq.f32.partialorder %v411_v7, 8.507059e+37  ;;  %v414_v34 = vor.u32 1.1754944e-38, %v413_v8  ;;  %v426_v35 = vand.u32 2147483647, %v371_v2 }
  0xf5   :  { %1710 = vrcp.f32 %v2024_v6  ;;  %vm392_vm9 = vweird.f32 %v369_v5  ;;  %v428_v39 = vand.u32 2147483648, %v371_v2  ;;  %v396_v41 = vand.u32 2147483647, %v369_v5  ;;  %1656 = vset.pattern.permute.xlu2 %v1822_v14 }
  0xf6   :  { %v398_v44 = vand.u32 2147483648, %v369_v5  ;;  %vm377_vm12 = vweird.f32 %v2024_v6  ;;  %v381_v48 = vand.u32 2147483647, %v2024_v6  ;;  %v383_v51 = vand.u32 2147483648, %v2024_v6  ;;  %668 = vperm.xlu2 %1656, %v1924_v18  }
  0xf7   :  { %v429_v60 = vor.u32 1.1754944e-38, %v428_v39  ;;  %vm427_vm3 = vcmp.eq.f32.partialorder %v426_v35, 8.507059e+37  ;;  %vm397_vm5 = vcmp.eq.f32.partialorder %v396_v41, 8.507059e+37 }
  0xf8   :  { %v1705_v12 = vpop.eup %1704  ;;  %v399_v17 = vor.u32 1.1754944e-38, %v398_v44  ;;  %v384_v9 = vor.u32 1.1754944e-38, %v383_v51 }
  0xf9   :  { %v1707_v13 = vpop.eup %1706  ;;  %v403_v19 = vmul.f32 %v1705_v12, %v370_v0  ;;  %vm408_vm10 = vweird.f32 %v1705_v12 }
  0xfa   :  { %v418_v29 = vmul.f32 %v1707_v13, %v371_v2  ;;  %v1709_v30 = vpop.eup %1708  ;;  %vm423_vm11 = vweird.f32 %v1707_v13  ;;  %vm409_vm13 = vmor %vm407_vm6, %vm408_vm10 }
  0xfb   :  { %v404_v31 = vsub.f32 1.0, %v403_v19  ;;  %v1711_v36 = vpop.eup %1710  ;;  %v388_v37 = vmul.f32 %v1709_v30, %v369_v5  ;;  %vm393_vm14 = vweird.f32 %v1709_v30  ;;  %vm424_vm2 = vmor %vm422_vm7, %vm423_vm11  ;;  %vm382_vm7 = vcmp.eq.f32.partialorder %v381_v48, 8.507059e+37 }
  0xfc   :  { %v419_v38 = vsub.f32 1.0, %v418_v29  ;;  %v373_v42 = vmul.f32 %v1711_v36, %v2024_v6  ;;  %vm378_vm15 = vweird.f32 %v1711_v36  ;;  %vm394_vm4 = vmor %vm392_vm9, %vm393_vm14 }
  0xfd   :  { %v405_v40 = vmul.f32 %v1705_v12, %v404_v31  ;;  %v389_v43 = vsub.f32 1.0, %v388_v37  ;;  %vm379_vm6 = vmor %vm377_vm12, %vm378_vm15  ;;  %v39_v31 = vpop.permute.xlu1 %38 }
  0xfe   :  { %v420_v45 = vmul.f32 %v1707_v13, %v419_v38  ;;  %v374_v47 = vsub.f32 1.0, %v373_v42  ;;  %v160_v32 = vadd.f32 %v2006_v33, %v39_v31  ;;  %1659 = vset.pattern.permute.xlu2 %v1820_v3 }
  0xff   :  { %v406_v46 = vadd.f32 %v1705_v12, %v405_v40  ;;  %v390_v50 = vmul.f32 %v1709_v30, %v389_v43 }
 0x100   :  { %v421_v57 = vadd.f32 %v1707_v13, %v420_v45  ;;  %v375_v59 = vmul.f32 %v1711_v36, %v374_v47 }
 0x101   :  { %v410_v58 = vsel %vm409_vm13, %v1705_v12, %v406_v46  ;;  %v391_v63 = vadd.f32 %v1709_v30, %v390_v50 }
 0x102   :  { %v415_v62 = vsel %vm2031_vm8, %v414_v34, %v410_v58  ;;  %v425_v0 = vsel %vm424_vm2, %v1707_v13, %v421_v57  ;;  %v376_v1 = vadd.f32 %v1711_v36, %v375_v59  ;;  %v44_v13 = vpop.permute.xlu0 %43  ;;  %v30_v59 = vld [vmem:[%s2357_s2 + $0x100] sm:$0xff] }
 0x103   :  { %v430_v7 = vsel %vm427_vm3, %v429_v60, %v425_v0  ;;  %v2051_v2 = vmul.f32 %v415_v62, %v2010_v52  ;;  %v395_v8 = vsel %vm394_vm4, %v1709_v30, %v391_v63  ;;  %v166_v52 = vadd.f32 %v2022_v61, %v49_v4 }
 0x104   :  { %v2057_v10 = vmul.f32 %v430_v7, %v2012_v53  ;;  %v400_v12 = vsel %vm397_vm5, %v399_v17, %v395_v8  ;;  %v380_v5 = vsel %vm379_vm6, %v1711_v36, %v376_v1  ;;  %v163_v6 = vadd.f32 %v2008_v49, %v44_v13  ;;  %v445_v36 = vpop.permute.xlu2 %444  ;;  %v2103_v1 = vld [vmem:[%s2357_s2 + $0x60] sm:$0xff]  ;;  %v32_v7 = vld [vmem:[%s2357_s2 + $0x110] sm:$0xff] }
 0x105   :  { %v2060_v15 = vmul.f32 %v400_v12, %v2014_v54  ;;  %v385_v19 = vsel %vm382_vm7, %v384_v9, %v380_v5  ;;  %v438_v53 = vadd.f32 %v2051_v2, %v166_v52  ;;  %v1824_v49 = vmov 16.0   ;;  %v450_v35 = vpop.permute.xlu1 %449  ;;  %994 = vperm.xlu1 %1664, %v2103_v1   ;;  %1579 = vmatmul.msk.f32.vlgmr.msra.gmra.mxu3 %vm111_vm0, %v32_v7  ;;  %v33_v9 = vld [vmem:[%s2357_s2 + $0x118] sm:$0xff] }
 0x106   :  { %v439_v29 = vadd.f32 %v2057_v10, %v169_v21  ;;  %v2065_v30 = vmul.f32 %v385_v19, %v2016_v56  ;;  %1712 = vrcp.f32 %v1824_v49  ;;  %v27_v21 = vld [vmem:[%s2357_s2 + $0xe8] sm:$0xff] }
 0x107   :  { %v437_v54 = vadd.f32 %v2060_v15, %v163_v6  ;;  %68 = vperm.xlu2 %1659, %v27_v21   ;;  %1574 = vmatmul.msk.f32.gmra.mxu0 %vm111_vm0, %v27_v21  ;;  %v2132_v6 = vld [vmem:[%s2357_s2 + $0x120] sm:$0xff]  ;;  %v2141_v21 = vld [vmem:[%s2357_s2 + $0x70] sm:$0xff] }
 0x108   :  { %468 = vmatpush.msra.mxu2 %v439_v29  ;;  %v436_v61 = vadd.f32 %v2065_v30, %v160_v32 }
 0x10a   :  { %469 = vmatpush.msra.mxu2 %v438_v53  ;;  %v521_v32 = vpop.permute.xlu0 %520 }
 0x10c   :  { %470 = vmatpush.msra.mxu2 %v437_v54  ;;  %v1713_v56 = vpop.eup %1712  ;;  %v525_v13 = vpop.permute.xlu2 %524 }
 0x10d   :  { %v487_v34 = vmul.f32 16.0, %v1713_v56  ;;  %vm491_vm8 = vweird.f32 %v1713_v56  ;;  %1670 = vset.pattern.permute.xlu1 %v1822_v14  ;;  %1580 = vmatmul.msk.f32.gmra.mxu3 %vm111_vm0, %v33_v9 }
 0x10e   :  { %471 = vmatpush.msra.mxu2 %v436_v61  ;;  %1072 = vperm.xlu1 %1670, %v2103_v1  }
 0x10f   :  { %1591 = vmatmul.msk.f32.vlgmr.msra.gmra.mxu2 %vm228_vm1, %v1982_v28  ;;  %v488_v39 = vsub.f32 1.0, %v487_v34  ;;  %1660 = vset.pattern.permute.xlu2 %v1821_v11  ;;  %v535_v34 = vpop.permute.xlu1 %534 }
 0x110   :  { %1575 = vmatmul.msk.f32.gmra.mxu0 %vm111_vm0, %v1946_v22  ;;  %779 = vperm.xlu2 %1660, %v1954_v23  }
 0x111   :  { %v489_v41 = vmul.f32 %v1713_v56, %v488_v39  ;;  %v2151_v39 = vld [vmem:[%s2357_s2 + $0x68] sm:$0xff] }
 0x113   :  { %v490_v44 = vadd.f32 %v1713_v56, %v489_v41 }
 0x114   :  { %v531_v49 = vpop.permute.xlu2 %530 }
 0x115   :  { %v2087_v47 = vsel %vm491_vm8, %v1713_v56, %v490_v44  ;;  %1581 = vmatmul.msk.f32.gmra.mxu3 %vm111_vm0, %v2132_v6 }
 0x116   :  { %1672 = vset.pattern.permute.xlu1 %v1820_v3 }
 0x117   :  { %1592 = vmatmul.msk.f32.gmra.mxu2 %vm228_vm1, %v1909_v16  ;;  %98 = vperm.xlu1 %1672, %v33_v9  }
 0x118   :  { %1576 = vmatmul.msk.f32.gmra.mxu0 %vm111_vm0, %v1960_v24  ;;  %1661 = vset.pattern.permute.xlu2 %v1820_v3 }
 0x119   :  { %812 = vperm.xlu2 %1661, %v1966_v25  }
 0x11f   :  { %1130 = vperm.xlu1 %1672, %v2141_v21  }
 0x120   :  { %1577 = vmatmul.msk.f32.gmra.mxu0 %vm111_vm0, %v30_v59 }
 0x121   :  { %83 = vperm.xlu2 %1661, %v30_v59  }
 0x127   :  { %1676 = vset.pattern.permute.xlu1 %v1821_v11 }
 0x128   :  { %1194 = vperm.xlu1 %1676, %v2151_v39  }
 0x129   :  { %1665 = vset.pattern.permute.xlu2 %v1821_v11 }
 0x12a   :  { %954 = vperm.xlu2 %1665, %v1973_v26   ;;  %v2115_v26 = vld [vmem:[%s2357_s2 + $0x58] sm:$0xff] }
 0x12b   :  { %1058 = vperm.xlu0 %1669, %v2115_v26  }
 0x130   :  { %1679 = vset.pattern.permute.xlu1 %v1820_v3 }
 0x132   :  { %1667 = vset.pattern.permute.xlu2 %v1820_v3 }
 0x133   :  { %989 = vperm.xlu2 %1667, %v2115_v26   ;;  %1674 = vset.pattern.permute.xlu0 %v1820_v3 }
 0x134   :  { %1125 = vperm.xlu0 %1674, %v2151_v39  }
 0x13b   :  { %1668 = vset.pattern.permute.xlu2 %v1821_v11 }
 0x13c   :  { %1062 = vperm.xlu2 %1668, %v2103_v1   ;;  %1678 = vset.pattern.permute.xlu0 %v1822_v14 }
 0x13d   :  { %1204 = vperm.xlu0 %1678, %v2151_v39  }
 0x144   :  { %1671 = vset.pattern.permute.xlu2 %v1822_v14 }
 0x145   :  { %1068 = vperm.xlu2 %1671, %v2115_v26   ;;  %1681 = vset.pattern.permute.xlu0 %v1820_v3 }
 0x14d   :  { %1673 = vset.pattern.permute.xlu2 %v1820_v3 }
 0x14e   :  { %93 = vperm.xlu2 %1673, %v32_v7  }
 0x156   :  { %1675 = vset.pattern.permute.xlu2 %v1821_v11 }
 0x157   :  { %1198 = vperm.xlu2 %1675, %v2141_v21  }
 0x15f   :  { %1677 = vset.pattern.permute.xlu2 %v1822_v14 }
 0x160   :  { %1208 = vperm.xlu2 %1677, %v2141_v21  }
 0x168   :  { %1680 = vset.pattern.permute.xlu2 %v1820_v3 }
 0x169   :  { %103 = vperm.xlu2 %1680, %v2132_v6   ;;  %v586_v6 = vpop.permute.xlu0 %585 }
 0x192   :  { %v473_v33 = vpop.f32.mrf.mxu2 }
 0x193   :  { %v474_v37 = vadd.f32 %v473_v33, %v445_v36 }
 0x19a   :  { %v476_v28 = vpop.f32.mrf.mxu2 }
 0x19b   :  { %v477_v38 = vadd.f32 %v476_v28, %v450_v35  ;;  %v35_v35 = vld [vmem:[%s2357_s2 + $0x128] sm:$0xff] }
 0x19c   :  { %1582 = vmatmul.msk.f32.gmra.mxu3 %vm111_vm0, %v35_v35  ;;  %108 = vperm.xlu1 %1679, %v35_v35  }
 0x19d   :  { %v479_v40 = vadd.f32 %v477_v38, %v474_v37 }
 0x19f   :  { %v480_v16 = vrot.slane %v479_v40, 4 }
 0x1a1   :  { %v481_v42 = vadd.f32 %v480_v16, %v479_v40 }
 0x1a3   :  { %v482_v43 = vrot.slane %v481_v42, 2 }
 0x1a5   :  { %v483_v45 = vadd.f32 %v482_v43, %v481_v42  ;;  %v171_v43 = vpop.f32.mrf.mxu0 }
 0x1a7   :  { %v484_v46 = vrot.slane %v483_v45, 1 }
 0x1a9   :  { %v485_v48 = vadd.f32 %v484_v46, %v483_v45 }
 0x1ab   :  { %v493_v22 = vmul.f32 %v2087_v47, %v485_v48 }
 0x1ad   :  { %v494_v50 = vsub.f32 %v474_v37, %v493_v22  ;;  %v495_v51 = vsub.f32 %v477_v38, %v493_v22 }
 0x1af   :  { %v496_v57 = vmul.f32 %v494_v50, %v494_v50  ;;  %v497_v58 = vmul.f32 %v495_v51, %v495_v51 }
 0x1b1   :  { %v498_v60 = vadd.f32 %v497_v58, %v496_v57 }
 0x1b3   :  { %v499_v24 = vrot.slane %v498_v60, 4 }
 0x1b5   :  { %v500_v62 = vadd.f32 %v499_v24, %v498_v60 }
 0x1b7   :  { %v501_v63 = vrot.slane %v500_v62, 2 }
 0x1b9   :  { %v502_v0 = vadd.f32 %v501_v63, %v500_v62  ;;  %v174_v62 = vpop.f32.mrf.mxu0 }
 0x1bb   :  { %v503_v25 = vrot.slane %v502_v0, 1 }
 0x1bd   :  { %v504_v17 = vadd.f32 %v503_v25, %v502_v0  ;;  %v64_v0 = vpop.permute.xlu1 %63 }
 0x1be   :  { %v175_v7 = vadd.f32 %v174_v62, %v64_v0 }
 0x1bf   :  { %v505_v4 = vmul.f32 %v504_v17, %v2087_v47 }
 0x1c1   :  { %v506_v8 = vadd.f32 1e-05, %v505_v4 }
 0x1c3   :  { %1714 = vrsqrt.f32 %v506_v8  ;;  %vm513_vm10 = vweird.f32 %v506_v8 }
 0x1c9   :  { %v1715_v12 = vpop.eup %1714 }
 0x1ca   :  { %v508_v5 = vmul.f32 %v1715_v12, %v506_v8  ;;  %vm514_vm9 = vweird.f32 %v1715_v12 }
 0x1cb   :  { %vm515_vm11 = vmor %vm513_vm10, %vm514_vm9 }
 0x1cc   :  { %v509_v19 = vmul.f32 %v1715_v12, %v508_v5 }
 0x1ce   :  { %v510_v52 = vmul.f32 0.5, %v509_v19 }
 0x1d0   :  { %v511_v29 = vsub.f32 1.5, %v510_v52 }
 0x1d2   :  { %v512_v53 = vmul.f32 %v1715_v12, %v511_v29 }
 0x1d4   :  { %v516_v31 = vsel %vm515_vm11, %v1715_v12, %v512_v53  ;;  %v59_v12 = vpop.permute.xlu2 %58 }
 0x1d5   :  { %v518_v54 = vmul.f32 %v516_v31, %v495_v51  ;;  %v517_v61 = vmul.f32 %v516_v31, %v494_v50  ;;  %v172_v29 = vadd.f32 %v171_v43, %v59_v12 }
 0x1d7   :  { %v528_v33 = vmul.f32 %v525_v13, %v518_v54  ;;  %v527_v56 = vmul.f32 %v521_v32, %v517_v61  ;;  %v2177_v32 = vpop.f32.mrf.mxu3 }
 0x1d9   :  { %v538_v36 = vadd.f32 %v535_v34, %v528_v33  ;;  %v537_v28 = vadd.f32 %v531_v49, %v527_v56  ;;  %v591_v56 = vpop.permute.xlu1 %590 }
 0x1db   :  { %v1594_v37 = vmul.f32 -1.442695, %v538_v36  ;;  %v1593_v38 = vmul.f32 -1.442695, %v537_v28 }
 0x1dc   :  { %v659_v0 = vpop.permute.xlu2 %658 }
 0x1dd   :  { %1716 = vpow2.f32 %v1594_v37 }
 0x1de   :  { %1718 = vpow2.f32 %v1593_v38 }
 0x1df   :  { %v2179_v54 = vpop.f32.mrf.mxu3 }
 0x1e1   :  { %v655_v12 = vpop.permute.xlu1 %654 }
 0x1e3   :  { %v1717_v40 = vpop.eup %1716 }
 0x1e4   :  { %v1719_v16 = vpop.eup %1718  ;;  %v546_v41 = vadd.f32 1.0, %v1717_v40 }
 0x1e5   :  { %v545_v42 = vadd.f32 1.0, %v1719_v16 }
 0x1e6   :  { %1720 = vrcp.f32 %v546_v41  ;;  %v573_v51 = vand.u32 2147483648, %v546_v41  ;;  %v571_v59 = vand.u32 2147483647, %v546_v41  ;;  %vm567_vm14 = vweird.f32 %v546_v41 }
 0x1e7   :  { %1722 = vrcp.f32 %v545_v42  ;;  %v558_v57 = vand.u32 2147483648, %v545_v42  ;;  %v556_v24 = vand.u32 2147483647, %v545_v42  ;;  %vm552_vm15 = vweird.f32 %v545_v42  ;;  %v2181_v61 = vpop.f32.mrf.mxu3 }
 0x1e8   :  { %v574_v17 = vor.u32 1.1754944e-38, %v573_v51  ;;  %vm572_vm4 = vcmp.eq.f32.partialorder %v571_v59, 8.507059e+37 }
 0x1e9   :  { %v559_v4 = vor.u32 1.1754944e-38, %v558_v57  ;;  %vm557_vm5 = vcmp.eq.f32.partialorder %v556_v24, 8.507059e+37 }
 0x1ec   :  { %v1721_v44 = vpop.eup %1720 }
 0x1ed   :  { %v1723_v45 = vpop.eup %1722  ;;  %v563_v46 = vmul.f32 %v1721_v44, %v546_v41  ;;  %vm568_vm12 = vweird.f32 %v1721_v44 }
 0x1ee   :  { %v548_v48 = vmul.f32 %v1723_v45, %v545_v42  ;;  %vm553_vm13 = vweird.f32 %v1723_v45  ;;  %vm569_vm2 = vmor %vm567_vm14, %vm568_vm12 }
 0x1ef   :  { %v564_v22 = vsub.f32 1.0, %v563_v46  ;;  %vm554_vm3 = vmor %vm552_vm15, %vm553_vm13 }
 0x1f0   :  { %v549_v50 = vsub.f32 1.0, %v548_v48 }
 0x1f1   :  { %v565_v58 = vmul.f32 %v1721_v44, %v564_v22 }
 0x1f2   :  { %v550_v60 = vmul.f32 %v1723_v45, %v549_v50 }
 0x1f3   :  { %v566_v63 = vadd.f32 %v1721_v44, %v565_v58 }
 0x1f4   :  { %v551_v25 = vadd.f32 %v1723_v45, %v550_v60 }
 0x1f5   :  { %v570_v8 = vsel %vm569_vm2, %v1721_v44, %v566_v63 }
 0x1f6   :  { %v555_v9 = vsel %vm554_vm3, %v1723_v45, %v551_v25  ;;  %v575_v5 = vsel %vm572_vm4, %v574_v17, %v570_v8 }
 0x1f7   :  { %v560_v13 = vsel %vm557_vm5, %v559_v4, %v555_v9  ;;  %v2165_v19 = vmul.f32 %v575_v5, %v538_v36 }
 0x1f8   :  { %v2167_v52 = vmul.f32 %v560_v13, %v537_v28 }
 0x1f9   :  { %v580_v53 = vadd.f32 %v2165_v19, %v175_v7 }
 0x1fa   :  { %v579_v31 = vadd.f32 %v2167_v52, %v172_v29  ;;  %v669_v29 = vpop.permute.xlu2 %668 }
 0x1fb   :  { %611 = vmatpush.msrb.mxu3 %v580_v53  ;;  %v665_v53 = vpop.permute.xlu0 %664 }
 0x1fd   :  { %612 = vmatpush.msrb.mxu3 %v579_v31 }
 0x1fe   :  { %1595 = vmatmul.msk.f32.vlgmr.msrb.gmra.mxu3 %vm111_vm0, %v1934_v20 }
 0x206   :  { %1596 = vmatmul.msk.f32.gmra.mxu3 %vm111_vm0, %v1924_v18 }
 0x21f   :  { %v2183_v49 = vpop.f32.mrf.mxu3 }
 0x281   :  { %v614_v33 = vpop.f32.mrf.mxu3 }
 0x282   :  { %v615_v35 = vadd.f32 %v614_v33, %v586_v6 }
 0x289   :  { %v617_v34 = vpop.f32.mrf.mxu3 }
 0x28a   :  { %v618_v36 = vadd.f32 %v617_v34, %v591_v56 }
 0x28c   :  { %v620_v28 = vadd.f32 %v618_v36, %v615_v35 }
 0x28e   :  { %v621_v37 = vrot.slane %v620_v28, 4 }
 0x290   :  { %v622_v20 = vadd.f32 %v621_v37, %v620_v28  ;;  %v177_v37 = vpop.f32.mrf.mxu0 }
 0x292   :  { %v623_v38 = vrot.slane %v622_v20, 2 }
 0x294   :  { %v624_v40 = vadd.f32 %v623_v38, %v622_v20 }
 0x296   :  { %v625_v18 = vrot.slane %v624_v40, 1 }
 0x298   :  { %v626_v16 = vadd.f32 %v625_v18, %v624_v40 }
 0x29a   :  { %v627_v41 = vmul.f32 %v626_v16, %v2087_v47 }
 0x29c   :  { %v628_v42 = vsub.f32 %v615_v35, %v627_v41  ;;  %v629_v43 = vsub.f32 %v618_v36, %v627_v41 }
 0x29e   :  { %v630_v44 = vmul.f32 %v628_v42, %v628_v42  ;;  %v631_v45 = vmul.f32 %v629_v43, %v629_v43 }
 0x2a0   :  { %v632_v46 = vadd.f32 %v631_v45, %v630_v44 }
 0x2a2   :  { %v633_v48 = vrot.slane %v632_v46, 4 }
 0x2a4   :  { %v634_v22 = vadd.f32 %v633_v48, %v632_v46 }
 0x2a6   :  { %v635_v50 = vrot.slane %v634_v22, 2 }
 0x2a8   :  { %v636_v51 = vadd.f32 %v635_v50, %v634_v22 }
 0x2aa   :  { %v637_v57 = vrot.slane %v636_v51, 1 }
 0x2ac   :  { %v638_v58 = vadd.f32 %v637_v57, %v636_v51  ;;  %v74_v57 = vpop.permute.xlu1 %73 }
 0x2ae   :  { %v639_v59 = vmul.f32 %v638_v58, %v2087_v47 }
 0x2b0   :  { %v640_v60 = vadd.f32 1e-05, %v639_v59  ;;  %v180_v59 = vpop.f32.mrf.mxu0 }
 0x2b2   :  { %1724 = vrsqrt.f32 %v640_v60  ;;  %vm647_vm7 = vweird.f32 %v640_v60 }
 0x2b8   :  { %v1725_v24 = vpop.eup %1724 }
 0x2b9   :  { %v642_v62 = vmul.f32 %v1725_v24, %v640_v60  ;;  %vm648_vm6 = vweird.f32 %v1725_v24 }
 0x2ba   :  { %vm649_vm8 = vmor %vm647_vm7, %vm648_vm6 }
 0x2bb   :  { %v643_v63 = vmul.f32 %v1725_v24, %v642_v62  ;;  %v181_v62 = vadd.f32 %v180_v59, %v74_v57 }
 0x2bd   :  { %v644_v25 = vmul.f32 0.5, %v643_v63 }
 0x2bf   :  { %v645_v17 = vsub.f32 1.5, %v644_v25 }
 0x2c1   :  { %v646_v4 = vmul.f32 %v1725_v24, %v645_v17 }
 0x2c3   :  { %v650_v7 = vsel %vm649_vm8, %v1725_v24, %v646_v4  ;;  %v69_v4 = vpop.permute.xlu2 %68 }
 0x2c4   :  { %v652_v8 = vmul.f32 %v650_v7, %v629_v43  ;;  %v651_v9 = vmul.f32 %v650_v7, %v628_v42  ;;  %v178_v7 = vadd.f32 %v177_v37, %v69_v4 }
 0x2c6   :  { %v662_v5 = vmul.f32 %v659_v0, %v652_v8  ;;  %v661_v13 = vmul.f32 %v655_v12, %v651_v9  ;;  %v1825_v12 = vmov 8.0  }
 0x2c8   :  { %v671_v31 = vadd.f32 %v665_v53, %v661_v13  ;;  %v672_v33 = vadd.f32 %v669_v29, %v662_v5  ;;  %v719_v29 = vpop.permute.xlu1 %718 }
 0x2ca   :  { %v1597_v6 = vmul.f32 -1.442695, %v671_v31  ;;  %v1598_v56 = vmul.f32 -1.442695, %v672_v33 }
 0x2cc   :  { %1726 = vpow2.f32 %v1597_v6 }
 0x2cd   :  { %1728 = vpow2.f32 %v1598_v56 }
 0x2d2   :  { %v1727_v34 = vpop.eup %1726 }
 0x2d3   :  { %v1729_v35 = vpop.eup %1728  ;;  %v679_v36 = vadd.f32 1.0, %v1727_v34 }
 0x2d4   :  { %v680_v28 = vadd.f32 1.0, %v1729_v35 }
 0x2d5   :  { %1730 = vrcp.f32 %v679_v36  ;;  %v692_v41 = vand.u32 2147483648, %v679_v36  ;;  %v690_v44 = vand.u32 2147483647, %v679_v36  ;;  %vm686_vm11 = vweird.f32 %v679_v36 }
 0x2d6   :  { %1732 = vrcp.f32 %v680_v28  ;;  %v707_v45 = vand.u32 2147483648, %v680_v28  ;;  %v705_v48 = vand.u32 2147483647, %v680_v28  ;;  %vm701_vm13 = vweird.f32 %v680_v28 }
 0x2d7   :  { %v693_v50 = vor.u32 1.1754944e-38, %v692_v41  ;;  %vm691_vm14 = vcmp.eq.f32.partialorder %v690_v44, 8.507059e+37  ;;  %1734 = vrcp.f32 %v1825_v12 }
 0x2d8   :  { %v708_v60 = vor.u32 1.1754944e-38, %v707_v45  ;;  %vm706_vm2 = vcmp.eq.f32.partialorder %v705_v48, 8.507059e+37 }
 0x2db   :  { %v1731_v20 = vpop.eup %1730 }
 0x2dc   :  { %v1733_v38 = vpop.eup %1732  ;;  %v682_v40 = vmul.f32 %v1731_v20, %v679_v36  ;;  %vm687_vm9 = vweird.f32 %v1731_v20 }
 0x2dd   :  { %v697_v18 = vmul.f32 %v1733_v38, %v680_v28  ;;  %vm702_vm10 = vweird.f32 %v1733_v38  ;;  %vm688_vm12 = vmor %vm686_vm11, %vm687_vm9  ;;  %v1735_v5 = vpop.eup %1734  ;;  %vm815_vm11 = vcmask 64512  }
 0x2de   :  { %v683_v16 = vsub.f32 1.0, %v682_v40  ;;  %vm703_vm15 = vmor %vm701_vm13, %vm702_vm10  ;;  %v750_v13 = vmul.f32 8.0, %v1735_v5  ;;  %vm754_vm3 = vweird.f32 %v1735_v5 }
 0x2df   :  { %v698_v42 = vsub.f32 1.0, %v697_v18 }
 0x2e0   :  { %v684_v43 = vmul.f32 %v1731_v20, %v683_v16 }
 0x2e1   :  { %v699_v46 = vmul.f32 %v1733_v38, %v698_v42 }
 0x2e2   :  { %v685_v22 = vadd.f32 %v1731_v20, %v684_v43 }
 0x2e3   :  { %v700_v51 = vadd.f32 %v1733_v38, %v699_v46 }
 0x2e4   :  { %v689_v58 = vsel %vm688_vm12, %v1731_v20, %v685_v22 }
 0x2e5   :  { %v694_v24 = vsel %vm691_vm14, %v693_v50, %v689_v58  ;;  %v704_v63 = vsel %vm703_vm15, %v1733_v38, %v700_v51 }
 0x2e6   :  { %v709_v0 = vsel %vm706_vm2, %v708_v60, %v704_v63  ;;  %v2187_v25 = vmul.f32 %v694_v24, %v671_v31  ;;  %v751_v31 = vsub.f32 1.0, %v750_v13 }
 0x2e7   :  { %v2189_v17 = vmul.f32 %v709_v0, %v672_v33  ;;  %v785_v0 = vpop.permute.xlu0 %784 }
 0x2e8   :  { %v713_v9 = vadd.f32 %v2187_v25, %v178_v7  ;;  %v752_v56 = vmul.f32 %v1735_v5, %v751_v31 }
 0x2e9   :  { %v714_v8 = vadd.f32 %v2189_v17, %v181_v62  ;;  %v780_v62 = vpop.permute.xlu2 %779 }
 0x2ea   :  { %v753_v36 = vadd.f32 %v1735_v5, %v752_v56 }
 0x2eb   :  { %737 = vmatpush.msra.mxu3 %v714_v8 }
 0x2ec   :  { %v2195_v20 = vsel %vm754_vm3, %v1735_v5, %v753_v36 }
 0x2ed   :  { %738 = vmatpush.msra.mxu3 %v713_v9 }
 0x2ee   :  { %1599 = vmatmul.msk.f32.vlgmr.msra.gmra.mxu3 %vm111_vm0, %v1954_v23 }
 0x371   :  { %v740_v53 = vpop.f32.mrf.mxu3 }
 0x372   :  { %v741_v33 = vadd.f32 %v740_v53, %v719_v29 }
 0x374   :  { %v743_v6 = vrot.slane %v741_v33, 4 }
 0x376   :  { %v744_v34 = vadd.f32 %v743_v6, %v741_v33  ;;  %v183_v6 = vpop.f32.mrf.mxu0 }
 0x378   :  { %v745_v35 = vrot.slane %v744_v34, 2 }
 0x37a   :  { %v746_v28 = vadd.f32 %v745_v35, %v744_v34  ;;  %v79_v35 = vpop.permute.xlu1 %78 }
 0x37c   :  { %v747_v37 = vrot.slane %v746_v28, 1 }
 0x37e   :  { %v748_v38 = vadd.f32 %v747_v37, %v746_v28  ;;  %v184_v28 = vadd.f32 %v183_v6, %v79_v35 }
 0x380   :  { %v756_v23 = vmul.f32 %v2195_v20, %v748_v38 }
 0x382   :  { %v757_v40 = vsub.f32 %v741_v33, %v756_v23  ;;  %v1792_v23 = vld [vmem:[%s2357_s2 + $0x48] sm:$0xff] }
 0x384   :  { %v758_v18 = vmul.f32 %v757_v40, %v757_v40 }
 0x386   :  { %v759_v16 = vrot.slane %v758_v18, 4 }
 0x388   :  { %v760_v41 = vadd.f32 %v759_v16, %v758_v18 }
 0x38a   :  { %v761_v42 = vrot.slane %v760_v41, 2 }
 0x38c   :  { %v762_v43 = vadd.f32 %v761_v42, %v760_v41 }
 0x38e   :  { %v763_v44 = vrot.slane %v762_v43, 1 }
 0x390   :  { %v764_v45 = vadd.f32 %v763_v44, %v762_v43 }
 0x392   :  { %v765_v46 = vmul.f32 %v764_v45, %v2195_v20 }
 0x394   :  { %v766_v48 = vadd.f32 1e-05, %v765_v46 }
 0x396   :  { %1736 = vrsqrt.f32 %v766_v48  ;;  %vm773_vm5 = vweird.f32 %v766_v48 }
 0x39c   :  { %v1737_v22 = vpop.eup %1736 }
 0x39d   :  { %v768_v50 = vmul.f32 %v1737_v22, %v766_v48  ;;  %vm774_vm4 = vweird.f32 %v1737_v22 }
 0x39e   :  { %vm775_vm6 = vmor %vm773_vm5, %vm774_vm4 }
 0x39f   :  { %v769_v51 = vmul.f32 %v1737_v22, %v768_v50 }
 0x3a1   :  { %v770_v57 = vmul.f32 0.5, %v769_v51 }
 0x3a3   :  { %v771_v58 = vsub.f32 1.5, %v770_v57 }
 0x3a5   :  { %v772_v59 = vmul.f32 %v1737_v22, %v771_v58 }
 0x3a7   :  { %v776_v60 = vsel %vm775_vm6, %v1737_v22, %v772_v59 }
 0x3a8   :  { %v777_v24 = vmul.f32 %v776_v60, %v757_v40  ;;  %v813_v40 = vpop.permute.xlu2 %812 }
 0x3aa   :  { %v782_v63 = vmul.f32 %v780_v62, %v777_v24 }
 0x3ac   :  { %v787_v4 = vadd.f32 %v785_v0, %v782_v63 }
 0x3ae   :  { %v1600_v7 = vmul.f32 -1.442695, %v787_v4 }
 0x3b0   :  { %1738 = vpow2.f32 %v1600_v7 }
 0x3b6   :  { %v1739_v8 = vpop.eup %1738 }
 0x3b7   :  { %v791_v9 = vadd.f32 1.0, %v1739_v8 }
 0x3b9   :  { %1740 = vrcp.f32 %v791_v9  ;;  %v803_v29 = vand.u32 2147483648, %v791_v9  ;;  %v801_v31 = vand.u32 2147483647, %v791_v9  ;;  %vm797_vm8 = vweird.f32 %v791_v9 }
 0x3bb   :  { %v804_v56 = vor.u32 1.1754944e-38, %v803_v29  ;;  %vm802_vm10 = vcmp.eq.f32.partialorder %v801_v31, 8.507059e+37  ;;  %v873_v31 = vpop.permute.xlu1 %872 }
 0x3bf   :  { %v1741_v12 = vpop.eup %1740 }
 0x3c0   :  { %v793_v5 = vmul.f32 %v1741_v12, %v791_v9  ;;  %vm798_vm7 = vweird.f32 %v1741_v12 }
 0x3c1   :  { %vm799_vm9 = vmor %vm797_vm8, %vm798_vm7 }
 0x3c2   :  { %v794_v13 = vsub.f32 1.0, %v793_v5  ;;  %v868_v5 = vpop.permute.xlu0 %867 }
 0x3c4   :  { %v795_v53 = vmul.f32 %v1741_v12, %v794_v13 }
 0x3c6   :  { %v796_v33 = vadd.f32 %v1741_v12, %v795_v53 }
 0x3c8   :  { %v800_v34 = vsel %vm799_vm9, %v1741_v12, %v796_v33 }
 0x3c9   :  { %v805_v36 = vsel %vm802_vm10, %v804_v56, %v800_v34 }
 0x3ca   :  { %v2199_v37 = vmul.f32 %v805_v36, %v787_v4 }
 0x3cc   :  { %v808_v38 = vadd.f32 %v2199_v37, %v184_v28 }
 0x3ce   :  { %833 = vmatpush.msrb.mxu2 %v808_v38 }
 0x3cf   :  { %1601 = vmatmul.msk.f32.vlgmr.msrb.gmra.mxu2 %vm815_vm11, %v1792_v23 }
 0x452   :  { %v835_v18 = vpop.f32.mrf.mxu2 }
 0x453   :  { %v836_v16 = vadd.f32 %v835_v18, %v813_v40 }
 0x455   :  { %v838_v41 = vrot.slane %v836_v16, 4 }
 0x457   :  { %v839_v42 = vadd.f32 %v838_v41, %v836_v16 }
 0x459   :  { %v840_v43 = vrot.slane %v839_v42, 2 }
 0x45b   :  { %v841_v44 = vadd.f32 %v840_v43, %v839_v42  ;;  %v84_v43 = vpop.permute.xlu2 %83 }
 0x45d   :  { %v842_v45 = vrot.slane %v841_v44, 1 }
 0x45f   :  { %v843_v46 = vadd.f32 %v842_v45, %v841_v44 }
 0x461   :  { %v844_v48 = vmul.f32 %v843_v46, %v2195_v20 }
 0x463   :  { %v845_v22 = vsub.f32 %v836_v16, %v844_v48  ;;  %v186_v16 = vpop.f32.mrf.mxu0 }
 0x464   :  { %v187_v45 = vadd.f32 %v186_v16, %v84_v43 }
 0x465   :  { %v846_v50 = vmul.f32 %v845_v22, %v845_v22 }
 0x467   :  { %v847_v51 = vrot.slane %v846_v50, 4 }
 0x469   :  { %v848_v57 = vadd.f32 %v847_v51, %v846_v50  ;;  %v901_v50 = vpop.permute.xlu1 %900 }
 0x46b   :  { %v849_v58 = vrot.slane %v848_v57, 2 }
 0x46d   :  { %v850_v59 = vadd.f32 %v849_v58, %v848_v57 }
 0x46f   :  { %v851_v60 = vrot.slane %v850_v59, 1 }
 0x471   :  { %v852_v24 = vadd.f32 %v851_v60, %v850_v59 }
 0x473   :  { %v853_v62 = vmul.f32 %v852_v24, %v2195_v20 }
 0x475   :  { %v854_v63 = vadd.f32 1e-05, %v853_v62 }
 0x477   :  { %1742 = vrsqrt.f32 %v854_v63  ;;  %vm861_vm13 = vweird.f32 %v854_v63 }
 0x47d   :  { %v1743_v0 = vpop.eup %1742 }
 0x47e   :  { %v856_v4 = vmul.f32 %v1743_v0, %v854_v63  ;;  %vm862_vm12 = vweird.f32 %v1743_v0 }
 0x47f   :  { %vm863_vm14 = vmor %vm861_vm13, %vm862_vm12 }
 0x480   :  { %v857_v7 = vmul.f32 %v1743_v0, %v856_v4 }
 0x482   :  { %v858_v8 = vmul.f32 0.5, %v857_v7 }
 0x484   :  { %v859_v9 = vsub.f32 1.5, %v858_v8 }
 0x486   :  { %v860_v12 = vmul.f32 %v1743_v0, %v859_v9 }
 0x488   :  { %v864_v13 = vsel %vm863_vm14, %v1743_v0, %v860_v12 }
 0x489   :  { %v865_v29 = vmul.f32 %v864_v13, %v845_v22  ;;  %v1793_v22 = vld [vmem:[%s2357_s2 + $0x50] sm:$0xff] }
 0x48b   :  { %v870_v53 = vmul.f32 %v868_v5, %v865_v29 }
 0x48d   :  { %v875_v33 = vadd.f32 %v873_v31, %v870_v53 }
 0x48f   :  { %v1602_v6 = vmul.f32 -1.442695, %v875_v33 }
 0x491   :  { %1744 = vpow2.f32 %v1602_v6 }
 0x497   :  { %v1745_v56 = vpop.eup %1744 }
 0x498   :  { %v879_v34 = vadd.f32 1.0, %v1745_v56 }
 0x49a   :  { %1746 = vrcp.f32 %v879_v34  ;;  %v891_v38 = vand.u32 2147483648, %v879_v34  ;;  %v889_v40 = vand.u32 2147483647, %v879_v34  ;;  %vm885_vm2 = vweird.f32 %v879_v34 }
 0x49c   :  { %v892_v41 = vor.u32 1.1754944e-38, %v891_v38  ;;  %vm890_vm4 = vcmp.eq.f32.partialorder %v889_v40, 8.507059e+37  ;;  %v960_v40 = vpop.permute.xlu0 %959 }
 0x4a0   :  { %v1747_v35 = vpop.eup %1746 }
 0x4a1   :  { %v881_v36 = vmul.f32 %v1747_v35, %v879_v34  ;;  %vm886_vm15 = vweird.f32 %v1747_v35 }
 0x4a2   :  { %vm887_vm3 = vmor %vm885_vm2, %vm886_vm15 }
 0x4a3   :  { %v882_v28 = vsub.f32 1.0, %v881_v36 }
 0x4a5   :  { %v883_v23 = vmul.f32 %v1747_v35, %v882_v28 }
 0x4a7   :  { %v884_v18 = vadd.f32 %v1747_v35, %v883_v23  ;;  %v955_v23 = vpop.permute.xlu2 %954 }
 0x4a9   :  { %v888_v42 = vsel %vm887_vm3, %v1747_v35, %v884_v18 }
 0x4aa   :  { %v893_v44 = vsel %vm890_vm4, %v892_v41, %v888_v42 }
 0x4ab   :  { %v895_v46 = vmul.f32 %v893_v44, %v875_v33 }
 0x4ad   :  { %v896_v48 = vadd.f32 %v895_v46, %v187_v45 }
 0x4af   :  { %920 = vmatpush.msrb.mxu3 %v896_v48 }
 0x4b0   :  { %1603 = vmatmul.msk.f32.vlgmr.msrb.gmra.mxu3 %vm815_vm11, %v1793_v22 }
 0x533   :  { %v922_v51 = vpop.f32.mrf.mxu3 }
 0x534   :  { %v923_v57 = vadd.f32 %v922_v51, %v901_v50 }
 0x536   :  { %v925_v58 = vrot.slane %v923_v57, 4 }
 0x538   :  { %v926_v59 = vadd.f32 %v925_v58, %v923_v57  ;;  %v89_v58 = vpop.permute.xlu1 %88 }
 0x53a   :  { %v927_v60 = vrot.slane %v926_v59, 2 }
 0x53c   :  { %v928_v24 = vadd.f32 %v927_v60, %v926_v59 }
 0x53e   :  { %v929_v62 = vrot.slane %v928_v24, 1 }
 0x540   :  { %v930_v63 = vadd.f32 %v929_v62, %v928_v24  ;;  %v190_v24 = vadd.f32 %v1976_v27, %v89_v58 }
 0x542   :  { %v931_v0 = vmul.f32 %v930_v63, %v2195_v20 }
 0x544   :  { %v932_v4 = vsub.f32 %v923_v57, %v931_v0 }
 0x546   :  { %v933_v7 = vmul.f32 %v932_v4, %v932_v4 }
 0x548   :  { %v934_v8 = vrot.slane %v933_v7, 4 }
 0x54a   :  { %v935_v9 = vadd.f32 %v934_v8, %v933_v7  ;;  %v995_v7 = vpop.permute.xlu1 %994 }
 0x54c   :  { %v936_v12 = vrot.slane %v935_v9, 2 }
 0x54e   :  { %v937_v5 = vadd.f32 %v936_v12, %v935_v9 }
 0x550   :  { %v938_v13 = vrot.slane %v937_v5, 1 }
 0x552   :  { %v939_v29 = vadd.f32 %v938_v13, %v937_v5 }
 0x554   :  { %v940_v53 = vmul.f32 %v939_v29, %v2195_v20 }
 0x556   :  { %v941_v31 = vadd.f32 1e-05, %v940_v53 }
 0x558   :  { %1748 = vrsqrt.f32 %v941_v31  ;;  %vm948_vm6 = vweird.f32 %v941_v31 }
 0x55e   :  { %v1749_v33 = vpop.eup %1748 }
 0x55f   :  { %v943_v6 = vmul.f32 %v1749_v33, %v941_v31  ;;  %vm949_vm5 = vweird.f32 %v1749_v33 }
 0x560   :  { %vm950_vm7 = vmor %vm948_vm6, %vm949_vm5 }
 0x561   :  { %v944_v56 = vmul.f32 %v1749_v33, %v943_v6 }
 0x563   :  { %v945_v34 = vmul.f32 0.5, %v944_v56 }
 0x565   :  { %v946_v35 = vsub.f32 1.5, %v945_v34 }
 0x567   :  { %v947_v36 = vmul.f32 %v1749_v33, %v946_v35 }
 0x569   :  { %v951_v28 = vsel %vm950_vm7, %v1749_v33, %v947_v36 }
 0x56a   :  { %v952_v38 = vmul.f32 %v951_v28, %v932_v4  ;;  %v990_v4 = vpop.permute.xlu2 %989 }
 0x56c   :  { %v957_v18 = vmul.f32 %v955_v23, %v952_v38 }
 0x56e   :  { %v962_v16 = vadd.f32 %v960_v40, %v957_v18 }
 0x570   :  { %v1604_v41 = vmul.f32 -1.442695, %v962_v16 }
 0x572   :  { %1750 = vpow2.f32 %v1604_v41 }
 0x578   :  { %v1751_v20 = vpop.eup %1750 }
 0x579   :  { %v966_v42 = vadd.f32 1.0, %v1751_v20 }
 0x57b   :  { %1752 = vrcp.f32 %v966_v42  ;;  %v978_v46 = vand.u32 2147483648, %v966_v42  ;;  %v976_v22 = vand.u32 2147483647, %v966_v42  ;;  %vm972_vm9 = vweird.f32 %v966_v42 }
 0x57d   :  { %v979_v51 = vor.u32 1.1754944e-38, %v978_v46  ;;  %vm977_vm12 = vcmp.eq.f32.partialorder %v976_v22, 8.507059e+37 }
 0x581   :  { %v1753_v43 = vpop.eup %1752 }
 0x582   :  { %v968_v44 = vmul.f32 %v1753_v43, %v966_v42  ;;  %vm973_vm8 = vweird.f32 %v1753_v43 }
 0x583   :  { %vm974_vm10 = vmor %vm972_vm9, %vm973_vm8 }
 0x584   :  { %v969_v45 = vsub.f32 1.0, %v968_v44 }
 0x586   :  { %v970_v48 = vmul.f32 %v1753_v43, %v969_v45 }
 0x588   :  { %v971_v50 = vadd.f32 %v1753_v43, %v970_v48  ;;  %v1059_v48 = vpop.permute.xlu0 %1058 }
 0x58a   :  { %v975_v57 = vsel %vm974_vm10, %v1753_v43, %v971_v50  ;;  %v1063_v43 = vpop.permute.xlu2 %1062 }
 0x58b   :  { %v980_v59 = vsel %vm977_vm12, %v979_v51, %v975_v57 }
 0x58c   :  { %v982_v60 = vmul.f32 %v980_v59, %v962_v16 }
 0x58e   :  { %v983_v62 = vadd.f32 %v982_v60, %v2199_v37  ;;  %v1073_v60 = vpop.permute.xlu1 %1072 }
 0x590   :  { %v984_v63 = vadd.f32 %v983_v62, %v190_v24 }
 0x592   :  { %1016 = vmatpush.msra.mxu2 %v984_v63  ;;  %v1069_v59 = vpop.permute.xlu2 %1068 }
 0x593   :  { %1605 = vmatmul.msk.f32.vlgmr.msra.gmra.mxu2 %vm815_vm11, %v2115_v26 }
 0x59b   :  { %1606 = vmatmul.msk.f32.gmra.mxu2 %vm815_vm11, %v2103_v1 }
 0x616   :  { %v1018_v0 = vpop.f32.mrf.mxu2 }
 0x617   :  { %v1019_v9 = vadd.f32 %v1018_v0, %v990_v4 }
 0x61e   :  { %v1021_v8 = vpop.f32.mrf.mxu2 }
 0x61f   :  { %v1022_v12 = vadd.f32 %v1021_v8, %v995_v7 }
 0x621   :  { %v1024_v5 = vadd.f32 %v1022_v12, %v1019_v9 }
 0x623   :  { %v1025_v13 = vrot.slane %v1024_v5, 4 }
 0x625   :  { %v1026_v29 = vadd.f32 %v1025_v13, %v1024_v5 }
 0x627   :  { %v1027_v27 = vrot.slane %v1026_v29, 2 }
 0x629   :  { %v1028_v53 = vadd.f32 %v1027_v27, %v1026_v29 }
 0x62b   :  { %v1029_v37 = vrot.slane %v1028_v53, 1 }
 0x62d   :  { %v1030_v31 = vadd.f32 %v1029_v37, %v1028_v53  ;;  %v2231_v37 = vld [vmem:[%s2357_s2 + $0x90] sm:$0xff] }
 0x62f   :  { %v1031_v33 = vmul.f32 %v1030_v31, %v2087_v47 }
 0x631   :  { %v1033_v6 = vsub.f32 %v1022_v12, %v1031_v33  ;;  %v1032_v26 = vsub.f32 %v1019_v9, %v1031_v33  ;;  %v2225_v12 = vld [vmem:[%s2357_s2 + $0x78] sm:$0xff] }
 0x632   :  { %1263 = vperm.xlu1 %1679, %v2225_v12  }
 0x633   :  { %v1035_v56 = vmul.f32 %v1033_v6, %v1033_v6  ;;  %v1034_v34 = vmul.f32 %v1032_v26, %v1032_v26 }
 0x635   :  { %v1036_v1 = vadd.f32 %v1035_v56, %v1034_v34 }
 0x637   :  { %v1037_v35 = vrot.slane %v1036_v1, 4 }
 0x639   :  { %v1038_v36 = vadd.f32 %v1037_v35, %v1036_v1 }
 0x63a   :  { %1278 = vperm.xlu1 %1679, %v2231_v37  }
 0x63b   :  { %v1039_v28 = vrot.slane %v1038_v36, 2 }
 0x63d   :  { %v1040_v38 = vadd.f32 %v1039_v28, %v1038_v36 }
 0x63f   :  { %v1041_v23 = vrot.slane %v1040_v38, 1 }
 0x641   :  { %v1042_v40 = vadd.f32 %v1041_v23, %v1040_v38 }
 0x642   :  { %1683 = vset.pattern.permute.xlu1 %v1821_v11 }
 0x643   :  { %v1043_v18 = vmul.f32 %v1042_v40, %v2087_v47 }
 0x645   :  { %v1044_v16 = vadd.f32 1e-05, %v1043_v18 }
 0x647   :  { %1754 = vrsqrt.f32 %v1044_v16  ;;  %vm1051_vm13 = vweird.f32 %v1044_v16 }
 0x64d   :  { %v1755_v41 = vpop.eup %1754 }
 0x64e   :  { %v1046_v20 = vmul.f32 %v1755_v41, %v1044_v16  ;;  %vm1052_vm11 = vweird.f32 %v1755_v41 }
 0x64f   :  { %vm1053_vm14 = vmor %vm1051_vm13, %vm1052_vm11 }
 0x650   :  { %v1047_v42 = vmul.f32 %v1755_v41, %v1046_v20 }
 0x652   :  { %v1048_v44 = vmul.f32 0.5, %v1047_v42  ;;  %v99_v42 = vpop.permute.xlu1 %98 }
 0x654   :  { %v1049_v45 = vsub.f32 1.5, %v1048_v44 }
 0x656   :  { %v1050_v46 = vmul.f32 %v1755_v41, %v1049_v45 }
 0x658   :  { %v1054_v22 = vsel %vm1053_vm14, %v1755_v41, %v1050_v46  ;;  %v94_v46 = vpop.permute.xlu2 %93 }
 0x659   :  { %v1055_v50 = vmul.f32 %v1054_v22, %v1032_v26  ;;  %v1056_v51 = vmul.f32 %v1054_v22, %v1033_v6 }
 0x65b   :  { %v1065_v57 = vmul.f32 %v1059_v48, %v1055_v50  ;;  %v1066_v58 = vmul.f32 %v1063_v43, %v1056_v51  ;;  %v196_v43 = vadd.f32 %v2179_v54, %v99_v42  ;;  %v193_v48 = vadd.f32 %v2177_v32, %v94_v46  ;;  %v2246_v54 = vld [vmem:[%s2357_s2 + $0x80] sm:$0xff] }
 0x65c   :  { %1268 = vperm.xlu2 %1680, %v2246_v54  }
 0x65d   :  { %v1075_v24 = vadd.f32 %v1069_v59, %v1065_v57  ;;  %v1076_v62 = vadd.f32 %v1073_v60, %v1066_v58 }
 0x65f   :  { %v1607_v63 = vmul.f32 -1.442695, %v1075_v24  ;;  %v1608_v0 = vmul.f32 -1.442695, %v1076_v62 }
 0x661   :  { %1756 = vpow2.f32 %v1607_v63 }
 0x662   :  { %1758 = vpow2.f32 %v1608_v0 }
 0x664   :  { %1682 = vset.pattern.permute.xlu2 %v1821_v11 }
 0x665   :  { %1374 = vperm.xlu2 %1682, %v2231_v37  }
 0x667   :  { %v1757_v4 = vpop.eup %1756 }
 0x668   :  { %v1759_v7 = vpop.eup %1758  ;;  %v1083_v8 = vadd.f32 1.0, %v1757_v4 }
 0x669   :  { %v1084_v9 = vadd.f32 1.0, %v1759_v7 }
 0x66a   :  { %1760 = vrcp.f32 %v1083_v8  ;;  %v1096_v31 = vand.u32 2147483648, %v1083_v8  ;;  %v1094_v26 = vand.u32 2147483647, %v1083_v8  ;;  %vm1090_vm3 = vweird.f32 %v1083_v8 }
 0x66b   :  { %1762 = vrcp.f32 %v1084_v9  ;;  %v1111_v56 = vand.u32 2147483648, %v1084_v9  ;;  %v1109_v1 = vand.u32 2147483647, %v1084_v9  ;;  %vm1105_vm5 = vweird.f32 %v1084_v9 }
 0x66c   :  { %v1097_v36 = vor.u32 1.1754944e-38, %v1096_v31  ;;  %vm1095_vm6 = vcmp.eq.f32.partialorder %v1094_v26, 8.507059e+37 }
 0x66d   :  { %v1112_v23 = vor.u32 1.1754944e-38, %v1111_v56  ;;  %vm1110_vm8 = vcmp.eq.f32.partialorder %v1109_v1, 8.507059e+37  ;;  %1684 = vset.pattern.permute.xlu2 %v1822_v14 }
 0x66e   :  { %1394 = vperm.xlu2 %1684, %v2231_v37  }
 0x670   :  { %v1761_v5 = vpop.eup %1760 }
 0x671   :  { %v1763_v13 = vpop.eup %1762  ;;  %v1086_v29 = vmul.f32 %v1761_v5, %v1083_v8  ;;  %vm1091_vm15 = vweird.f32 %v1761_v5 }
 0x672   :  { %v1101_v27 = vmul.f32 %v1763_v13, %v1084_v9  ;;  %vm1106_vm2 = vweird.f32 %v1763_v13  ;;  %vm1092_vm4 = vmor %vm1090_vm3, %vm1091_vm15 }
 0x673   :  { %v1087_v53 = vsub.f32 1.0, %v1086_v29  ;;  %vm1107_vm7 = vmor %vm1105_vm5, %vm1106_vm2 }
 0x674   :  { %v1102_v33 = vsub.f32 1.0, %v1101_v27 }
 0x675   :  { %v1088_v6 = vmul.f32 %v1761_v5, %v1087_v53 }
 0x676   :  { %v1103_v34 = vmul.f32 %v1763_v13, %v1102_v33  ;;  %1687 = vset.pattern.permute.xlu2 %v1821_v11 }
 0x677   :  { %v1089_v35 = vadd.f32 %v1761_v5, %v1088_v6  ;;  %1362 = vperm.xlu2 %1687, %v2225_v12  }
 0x678   :  { %v1104_v28 = vadd.f32 %v1763_v13, %v1103_v34 }
 0x679   :  { %v1093_v38 = vsel %vm1092_vm4, %v1761_v5, %v1089_v35  ;;  %v1199_v35 = vpop.permute.xlu2 %1198 }
 0x67a   :  { %v1098_v40 = vsel %vm1095_vm6, %v1097_v36, %v1093_v38  ;;  %v1108_v18 = vsel %vm1107_vm7, %v1763_v13, %v1104_v28 }
 0x67b   :  { %v1113_v16 = vsel %vm1110_vm8, %v1112_v23, %v1108_v18  ;;  %v1115_v41 = vmul.f32 %v1098_v40, %v1075_v24 }
 0x67c   :  { %v1116_v20 = vmul.f32 %v1113_v16, %v1076_v62 }
 0x67d   :  { %v1117_v45 = vadd.f32 %v1115_v41, %v2187_v25  ;;  %v1131_v25 = vpop.permute.xlu1 %1130 }
 0x67e   :  { %v1118_v44 = vadd.f32 %v1116_v20, %v2189_v17 }
 0x67f   :  { %v1119_v50 = vadd.f32 %v1117_v45, %v193_v48  ;;  %1688 = vset.pattern.permute.xlu2 %v1822_v14 }
 0x680   :  { %v1120_v22 = vadd.f32 %v1118_v44, %v196_v43  ;;  %1382 = vperm.xlu2 %1688, %v2225_v12  }
 0x682   :  { %1151 = vmatpush.msra.mxu3 %v1120_v22 }
 0x684   :  { %1152 = vmatpush.msra.mxu3 %v1119_v50 }
 0x685   :  { %1609 = vmatmul.msk.f32.vlgmr.msra.gmra.mxu3 %vm111_vm0, %v2151_v39  ;;  %v1126_v39 = vpop.permute.xlu0 %1125  ;;  %v1195_v16 = vpop.permute.xlu1 %1194 }
 0x688   :  { %1691 = vset.pattern.permute.xlu2 %v1820_v3 }
 0x68d   :  { %1610 = vmatmul.msk.f32.gmra.mxu3 %vm111_vm0, %v2141_v21  ;;  %v1205_v41 = vpop.permute.xlu0 %1204 }
 0x708   :  { %v1154_v32 = vpop.f32.mrf.mxu3 }
 0x709   :  { %v1155_v21 = vadd.f32 %v1154_v32, %v1126_v39  ;;  %v1259_v39 = vld [vmem:[%s2357_s2 + $0x88] sm:$0xff] }
 0x70a   :  { %1273 = vperm.xlu0 %1681, %v1259_v39   ;;  %1370 = vperm.xlu1 %1683, %v1259_v39  }
 0x710   :  { %v1157_v17 = vpop.f32.mrf.mxu3 }
 0x711   :  { %v1158_v51 = vadd.f32 %v1157_v17, %v1131_v25 }
 0x712   :  { %1686 = vset.pattern.permute.xlu1 %v1822_v14  ;;  %1685 = vset.pattern.permute.xlu0 %v1821_v11 }
 0x713   :  { %v1160_v57 = vadd.f32 %v1158_v51, %v1155_v21  ;;  %1390 = vperm.xlu1 %1686, %v1259_v39   ;;  %1366 = vperm.xlu0 %1685, %v2246_v54  }
 0x715   :  { %v1161_v58 = vrot.slane %v1160_v57, 4 }
 0x717   :  { %v1162_v59 = vadd.f32 %v1161_v58, %v1160_v57 }
 0x719   :  { %v1163_v60 = vrot.slane %v1162_v59, 2 }
 0x71b   :  { %v1164_v24 = vadd.f32 %v1163_v60, %v1162_v59  ;;  %1386 = vperm.xlu1 %1686, %v2246_v54   ;;  %1689 = vset.pattern.permute.xlu0 %v1820_v3 }
 0x71d   :  { %v1165_v62 = vrot.slane %v1164_v24, 1 }
 0x71f   :  { %v1166_v63 = vadd.f32 %v1165_v62, %v1164_v24 }
 0x721   :  { %v1167_v0 = vmul.f32 %v1166_v63, %v2087_v47 }
 0x723   :  { %v1168_v4 = vsub.f32 %v1155_v21, %v1167_v0  ;;  %v1169_v7 = vsub.f32 %v1158_v51, %v1167_v0  ;;  %1690 = vset.pattern.permute.xlu1 %v1820_v3 }
 0x725   :  { %v1170_v8 = vmul.f32 %v1168_v4, %v1168_v4  ;;  %v1171_v9 = vmul.f32 %v1169_v7, %v1169_v7 }
 0x727   :  { %v1172_v5 = vadd.f32 %v1171_v9, %v1170_v8 }
 0x729   :  { %v1173_v13 = vrot.slane %v1172_v5, 4 }
 0x72b   :  { %v1174_v29 = vadd.f32 %v1173_v13, %v1172_v5  ;;  %v109_v13 = vpop.permute.xlu1 %108 }
 0x72d   :  { %v1175_v27 = vrot.slane %v1174_v29, 2 }
 0x72f   :  { %v1176_v53 = vadd.f32 %v1175_v27, %v1174_v29 }
 0x731   :  { %v1177_v31 = vrot.slane %v1176_v53, 1 }
 0x733   :  { %v1178_v33 = vadd.f32 %v1177_v31, %v1176_v53 }
 0x735   :  { %v1179_v6 = vmul.f32 %v1178_v33, %v2087_v47  ;;  %v1209_v47 = vpop.permute.xlu2 %1208  ;;  %v202_v33 = vadd.f32 %v2183_v49, %v109_v13 }
 0x737   :  { %v1180_v26 = vadd.f32 1e-05, %v1179_v6 }
 0x739   :  { %1764 = vrsqrt.f32 %v1180_v26  ;;  %vm1187_vm10 = vweird.f32 %v1180_v26 }
 0x73d   :  { %v104_v53 = vpop.permute.xlu2 %103 }
 0x73f   :  { %v1765_v56 = vpop.eup %1764 }
 0x740   :  { %v1182_v34 = vmul.f32 %v1765_v56, %v1180_v26  ;;  %vm1188_vm9 = vweird.f32 %v1765_v56 }
 0x741   :  { %vm1189_vm12 = vmor %vm1187_vm10, %vm1188_vm9 }
 0x742   :  { %v1183_v1 = vmul.f32 %v1765_v56, %v1182_v34 }
 0x744   :  { %v1184_v36 = vmul.f32 0.5, %v1183_v1 }
 0x746   :  { %v1185_v28 = vsub.f32 1.5, %v1184_v36 }
 0x748   :  { %v1186_v38 = vmul.f32 %v1765_v56, %v1185_v28 }
 0x74a   :  { %v1190_v23 = vsel %vm1189_vm12, %v1765_v56, %v1186_v38  ;;  %v199_v56 = vadd.f32 %v2181_v61, %v104_v53  ;;  %v1264_v61 = vpop.permute.xlu1 %1263 }
 0x74b   :  { %v1192_v40 = vmul.f32 %v1190_v23, %v1169_v7  ;;  %v1191_v18 = vmul.f32 %v1190_v23, %v1168_v4 }
 0x74d   :  { %v1202_v20 = vmul.f32 %v1199_v35, %v1192_v40  ;;  %v1201_v42 = vmul.f32 %v1195_v16, %v1191_v18  ;;  %v1269_v35 = vpop.permute.xlu2 %1268 }
 0x74f   :  { %v1212_v43 = vadd.f32 %v1209_v47, %v1202_v20  ;;  %v1211_v44 = vadd.f32 %v1205_v41, %v1201_v42 }
 0x751   :  { %v1612_v45 = vmul.f32 -1.442695, %v1212_v43  ;;  %v1611_v46 = vmul.f32 -1.442695, %v1211_v44 }
 0x752   :  { %v1279_v40 = vpop.permute.xlu1 %1278 }
 0x753   :  { %1766 = vpow2.f32 %v1612_v45 }
 0x754   :  { %1768 = vpow2.f32 %v1611_v46 }
 0x759   :  { %v1767_v48 = vpop.eup %1766 }
 0x75a   :  { %v1769_v22 = vpop.eup %1768  ;;  %v1220_v50 = vadd.f32 1.0, %v1767_v48 }
 0x75b   :  { %v1219_v32 = vadd.f32 1.0, %v1769_v22 }
 0x75c   :  { %1770 = vrcp.f32 %v1220_v50  ;;  %v1247_v58 = vand.u32 2147483648, %v1220_v50  ;;  %v1245_v24 = vand.u32 2147483647, %v1220_v50  ;;  %vm1241_vm14 = vweird.f32 %v1220_v50 }
 0x75d   :  { %1772 = vrcp.f32 %v1219_v32  ;;  %v1232_v62 = vand.u32 2147483648, %v1219_v32  ;;  %v1230_v0 = vand.u32 2147483647, %v1219_v32  ;;  %vm1226_vm2 = vweird.f32 %v1219_v32 }
 0x75e   :  { %v1248_v7 = vor.u32 1.1754944e-38, %v1247_v58  ;;  %vm1246_vm3 = vcmp.eq.f32.partialorder %v1245_v24, 8.507059e+37 }
 0x75f   :  { %v1233_v5 = vor.u32 1.1754944e-38, %v1232_v62  ;;  %vm1231_vm5 = vcmp.eq.f32.partialorder %v1230_v0, 8.507059e+37 }
 0x762   :  { %v1771_v25 = vpop.eup %1770 }
 0x763   :  { %v1773_v17 = vpop.eup %1772  ;;  %v1237_v21 = vmul.f32 %v1771_v25, %v1220_v50  ;;  %vm1242_vm11 = vweird.f32 %v1771_v25 }
 0x764   :  { %v1222_v51 = vmul.f32 %v1773_v17, %v1219_v32  ;;  %vm1227_vm13 = vweird.f32 %v1773_v17  ;;  %vm1243_vm15 = vmor %vm1241_vm14, %vm1242_vm11 }
 0x765   :  { %v1238_v57 = vsub.f32 1.0, %v1237_v21  ;;  %vm1228_vm4 = vmor %vm1226_vm2, %vm1227_vm13 }
 0x766   :  { %v1223_v59 = vsub.f32 1.0, %v1222_v51 }
 0x767   :  { %v1239_v60 = vmul.f32 %v1771_v25, %v1238_v57 }
 0x768   :  { %v1224_v63 = vmul.f32 %v1773_v17, %v1223_v59 }
 0x769   :  { %v1240_v4 = vadd.f32 %v1771_v25, %v1239_v60  ;;  %v1375_v60 = vpop.permute.xlu2 %1374 }
 0x76a   :  { %v1225_v8 = vadd.f32 %v1773_v17, %v1224_v63 }
 0x76b   :  { %v1244_v9 = vsel %vm1243_vm15, %v1771_v25, %v1240_v4 }
 0x76c   :  { %v1249_v14 = vsel %vm1246_vm3, %v1248_v7, %v1244_v9  ;;  %v1229_v29 = vsel %vm1228_vm4, %v1773_v17, %v1225_v8 }
 0x76d   :  { %v1252_v11 = vmul.f32 %v1249_v14, %v1212_v43  ;;  %v1234_v27 = vsel %vm1231_vm5, %v1233_v5, %v1229_v29 }
 0x76e   :  { %v1251_v31 = vmul.f32 %v1234_v27, %v1211_v44 }
 0x76f   :  { %v1254_v6 = vadd.f32 %v1252_v11, %v2165_v19 }
 0x770   :  { %v1253_v26 = vadd.f32 %v1251_v31, %v2167_v52 }
 0x771   :  { %v1256_v34 = vadd.f32 %v1254_v6, %v202_v33  ;;  %v1395_v7 = vpop.permute.xlu2 %1394 }
 0x772   :  { %v1255_v1 = vadd.f32 %v1253_v26, %v199_v56 }
 0x773   :  { %1303 = vmatpush.msra.mxu1 %v1256_v34 }
 0x775   :  { %1304 = vmatpush.msra.mxu1 %v1255_v1 }
 0x776   :  { %1613 = vmatmul.msk.f32.vlgmr.msra.gmra.mxu1 %vm111_vm0, %v2225_v12 }
 0x779   :  { %v1363_v14 = vpop.permute.xlu2 %1362 }
 0x77c   :  { %v1274_v36 = vpop.permute.xlu0 %1273  ;;  %v1371_v8 = vpop.permute.xlu1 %1370 }
 0x77e   :  { %1614 = vmatmul.msk.f32.gmra.mxu1 %vm111_vm0, %v2246_v54 }
 0x781   :  { %v1383_v34 = vpop.permute.xlu2 %1382 }
 0x785   :  { %v1391_v11 = vpop.permute.xlu1 %1390  ;;  %v1367_v33 = vpop.permute.xlu0 %1366 }
 0x786   :  { %1615 = vmatmul.msk.f32.gmra.mxu1 %vm111_vm0, %v1259_v39 }
 0x78e   :  { %1616 = vmatmul.msk.f32.gmra.mxu1 %vm111_vm0, %v2231_v37 }
 0x7f3   :  { %v1306_v19 = vpop.f32.mrf.mxu1 }
 0x7f4   :  { %v1307_v38 = vadd.f32 %v1306_v19, %v1264_v61 }
 0x7fb   :  { %v1309_v52 = vpop.f32.mrf.mxu1 }
 0x7fc   :  { %v1310_v28 = vadd.f32 %v1309_v52, %v1269_v35 }
 0x7fe   :  { %v1318_v12 = vadd.f32 %v1310_v28, %v1307_v38 }
 0x803   :  { %v1312_v49 = vpop.f32.mrf.mxu1 }
 0x804   :  { %v1313_v23 = vadd.f32 %v1312_v49, %v1274_v36  ;;  %v1387_v49 = vpop.permute.xlu1 %1386 }
 0x806   :  { %v1319_v18 = vadd.f32 %v1318_v12, %v1313_v23 }
 0x80b   :  { %v1315_v3 = vpop.f32.mrf.mxu1 }
 0x80c   :  { %v1316_v16 = vadd.f32 %v1315_v3, %v1279_v40 }
 0x80e   :  { %v1320_v54 = vadd.f32 %v1319_v18, %v1316_v16  ;;  %v2297_v18 = vld [vmem:[%s2357_s2 + $0x98] sm:$0xff] }
 0x80f   :  { %1491 = vperm.xlu0 %1689, %v2297_v18  }
 0x810   :  { %v1321_v41 = vrot.slane %v1320_v54, 4 }
 0x812   :  { %v1322_v20 = vadd.f32 %v1321_v41, %v1320_v54  ;;  %v2302_v54 = vld [vmem:[%s2357_s2 + $0xa0] sm:$0xff] }
 0x813   :  { %1496 = vperm.xlu1 %1690, %v2302_v54  }
 0x814   :  { %v1323_v42 = vrot.slane %v1322_v20, 2 }
 0x816   :  { %v1324_v47 = vadd.f32 %v1323_v42, %v1322_v20 }
 0x818   :  { %v1325_v37 = vrot.slane %v1324_v47, 1 }
 0x81a   :  { %v1326_v43 = vadd.f32 %v1325_v37, %v1324_v47 }
 0x81c   :  { %v1327_v44 = vmul.f32 %v1326_v43, %v1999_v55 }
 0x81e   :  { %v1328_v45 = vsub.f32 %v1307_v38, %v1327_v44  ;;  %v1329_v46 = vsub.f32 %v1310_v28, %v1327_v44  ;;  %v1330_v48 = vsub.f32 %v1313_v23, %v1327_v44  ;;  %v1331_v22 = vsub.f32 %v1316_v16, %v1327_v44 }
 0x820   :  { %v1332_v50 = vmul.f32 %v1328_v45, %v1328_v45  ;;  %v1333_v32 = vmul.f32 %v1329_v46, %v1329_v46  ;;  %v1334_v39 = vmul.f32 %v1330_v48, %v1330_v48  ;;  %v1335_v17 = vmul.f32 %v1331_v22, %v1331_v22 }
 0x822   :  { %v1336_v25 = vadd.f32 %v1333_v32, %v1332_v50 }
 0x824   :  { %v1337_v21 = vadd.f32 %v1336_v25, %v1334_v39 }
 0x826   :  { %v1338_v51 = vadd.f32 %v1337_v21, %v1335_v17 }
 0x828   :  { %v1339_v57 = vrot.slane %v1338_v51, 4 }
 0x82a   :  { %v1340_v58 = vadd.f32 %v1339_v57, %v1338_v51 }
 0x82c   :  { %v1341_v59 = vrot.slane %v1340_v58, 2 }
 0x82e   :  { %v1342_v24 = vadd.f32 %v1341_v59, %v1340_v58 }
 0x830   :  { %v1343_v62 = vrot.slane %v1342_v24, 1 }
 0x832   :  { %v1344_v63 = vadd.f32 %v1343_v62, %v1342_v24 }
 0x834   :  { %v1345_v0 = vmul.f32 %v1344_v63, %v1999_v55 }
 0x836   :  { %v1346_v4 = vadd.f32 1e-05, %v1345_v0 }
 0x838   :  { %1774 = vrsqrt.f32 %v1346_v4  ;;  %vm1353_vm6 = vweird.f32 %v1346_v4 }
 0x83e   :  { %v1775_v9 = vpop.eup %1774 }
 0x83f   :  { %v1348_v5 = vmul.f32 %v1775_v9, %v1346_v4  ;;  %vm1354_vm0 = vweird.f32 %v1775_v9 }
 0x840   :  { %vm1355_vm7 = vmor %vm1353_vm6, %vm1354_vm0 }
 0x841   :  { %v1349_v13 = vmul.f32 %v1775_v9, %v1348_v5 }
 0x843   :  { %v1350_v29 = vmul.f32 0.5, %v1349_v13  ;;  %v1488_v13 = vld [vmem:[%s2357_s2 + $0xb0] sm:$0xff] }
 0x844   :  { %1506 = vperm.xlu1 %1690, %v1488_v13  }
 0x845   :  { %v1351_v27 = vsub.f32 1.5, %v1350_v29 }
 0x847   :  { %v1352_v53 = vmul.f32 %v1775_v9, %v1351_v27 }
 0x849   :  { %v1356_v31 = vsel %vm1355_vm7, %v1775_v9, %v1352_v53 }
 0x84a   :  { %v1360_v6 = vmul.f32 %v1356_v31, %v1331_v22  ;;  %v1359_v26 = vmul.f32 %v1356_v31, %v1330_v48  ;;  %v1357_v55 = vmul.f32 %v1356_v31, %v1328_v45  ;;  %v1358_v56 = vmul.f32 %v1356_v31, %v1329_v46  ;;  %v2312_v45 = vld [vmem:[%s2357_s2 + $0xa8] sm:$0xff]  ;;  %s1826_s2 = smov [#allocation2]  }
 0x84b   :  { %1501 = vperm.xlu2 %1691, %v2312_v45   ;;  %s1554_s17 = sshll.u32 %s1826_s2, 4  ;;  %s1555_s17 = int_to_ptr.vmem [resolvable:$true] %s1554_s17 }
 0x84c   :  { %v1380_v1 = vmul.f32 %v1375_v60, %v1360_v6  ;;  %v1379_v19 = vmul.f32 %v1371_v8, %v1359_v26  ;;  %v1377_v52 = vmul.f32 %v1363_v14, %v1357_v55  ;;  %v1378_v61 = vmul.f32 %v1367_v33, %v1358_v56 }
 0x84e   :  { %v2282_v35 = vadd.f32 %v1395_v7, %v1380_v1  ;;  %v2284_v36 = vadd.f32 %v1391_v11, %v1379_v19  ;;  %v2286_v28 = vadd.f32 %v1383_v34, %v1377_v52  ;;  %v2288_v38 = vadd.f32 %v1387_v49, %v1378_v61 }
 0x850   :  { %v1620_v23 = vmul.f32 -1.442695, %v2282_v35  ;;  %v1619_v12 = vmul.f32 -1.442695, %v2284_v36  ;;  %v1617_v40 = vmul.f32 -1.442695, %v2286_v28 }
 0x851   :  { %v1618_v3 = vmul.f32 -1.442695, %v2288_v38 }
 0x852   :  { %1776 = vpow2.f32 %v1620_v23 }
 0x853   :  { %1778 = vpow2.f32 %v1619_v12 }
 0x854   :  { %1780 = vpow2.f32 %v1617_v40 }
 0x855   :  { %1782 = vpow2.f32 %v1618_v3 }
 0x858   :  { %v1777_v16 = vpop.eup %1776 }
 0x859   :  { %v1779_v41 = vpop.eup %1778  ;;  %v1416_v20 = vadd.f32 1.0, %v1777_v16 }
 0x85a   :  { %v1781_v42 = vpop.eup %1780  ;;  %v1415_v47 = vadd.f32 1.0, %v1779_v41 }
 0x85b   :  { %v1783_v37 = vpop.eup %1782  ;;  %1784 = vrcp.f32 %v1416_v20  ;;  %v1413_v43 = vadd.f32 1.0, %v1781_v42  ;;  %v1471_v48 = vand.u32 2147483647, %v1416_v20  ;;  %v1473_v32 = vand.u32 2147483648, %v1416_v20 }
 0x85c   :  { %1786 = vrcp.f32 %v1415_v47  ;;  %v2306_v44 = vadd.f32 1.0, %v1783_v37  ;;  %v1456_v25 = vand.u32 2147483647, %v1415_v47  ;;  %v1458_v21 = vand.u32 2147483648, %v1415_v47 }
 0x85d   :  { %1788 = vrcp.f32 %v1413_v43  ;;  %vm1467_vm8 = vweird.f32 %v1416_v20  ;;  %vm2315_vm9 = vcmp.eq.f32.partialorder %v1471_v48, 8.507059e+37  ;;  %vm1452_vm10 = vweird.f32 %v1415_v47 }
 0x85e   :  { %1790 = vrcp.f32 %v2306_v44  ;;  %v1474_v24 = vor.u32 1.1754944e-38, %v1473_v32  ;;  %vm2319_vm13 = vcmp.eq.f32.partialorder %v1456_v25, 8.507059e+37  ;;  %v1459_v8 = vor.u32 1.1754944e-38, %v1458_v21 }
 0x85f   :  { %v1426_v5 = vand.u32 2147483647, %v1413_v43  ;;  %v1428_v29 = vand.u32 2147483648, %v1413_v43  ;;  %v1441_v27 = vand.u32 2147483647, %v2306_v44  ;;  %v1443_v33 = vand.u32 2147483648, %v2306_v44 }
 0x860   :  { %vm1422_vm4 = vweird.f32 %v1413_v43  ;;  %vm1437_vm0 = vweird.f32 %v2306_v44 }
 0x861   :  { %v1785_v46 = vpop.eup %1784  ;;  %v1429_v52 = vor.u32 1.1754944e-38, %v1428_v29  ;;  %vm1427_vm6 = vcmp.eq.f32.partialorder %v1426_v5, 8.507059e+37  ;;  %v1444_v12 = vor.u32 1.1754944e-38, %v1443_v33 }
 0x862   :  { %v1787_v22 = vpop.eup %1786  ;;  %v1463_v50 = vmul.f32 %v1785_v46, %v1416_v20  ;;  %vm1468_vm12 = vweird.f32 %v1785_v46 }
 0x863   :  { %v1448_v39 = vmul.f32 %v1787_v22, %v1415_v47  ;;  %v1789_v51 = vpop.eup %1788  ;;  %vm1453_vm11 = vweird.f32 %v1787_v22  ;;  %vm1469_vm14 = vmor %vm1467_vm8, %vm1468_vm12  ;;  %vm1442_vm8 = vcmp.eq.f32.partialorder %v1441_v27, 8.507059e+37 }
 0x864   :  { %v1464_v17 = vsub.f32 1.0, %v1463_v50  ;;  %v1791_v59 = vpop.eup %1790  ;;  %v1418_v62 = vmul.f32 %v1789_v51, %v1413_v43  ;;  %vm1454_vm15 = vmor %vm1452_vm10, %vm1453_vm11  ;;  %vm1423_vm2 = vweird.f32 %v1789_v51 }
 0x865   :  { %v1449_v58 = vsub.f32 1.0, %v1448_v39  ;;  %v1433_v4 = vmul.f32 %v1791_v59, %v2306_v44  ;;  %vm1438_vm3 = vweird.f32 %v1791_v59  ;;  %vm1424_vm5 = vmor %vm1422_vm4, %vm1423_vm2 }
 0x866   :  { %v1465_v60 = vmul.f32 %v1785_v46, %v1464_v17  ;;  %v1419_v9 = vsub.f32 1.0, %v1418_v62  ;;  %vm1439_vm7 = vmor %vm1437_vm0, %vm1438_vm3 }
 0x867   :  { %v1450_v63 = vmul.f32 %v1787_v22, %v1449_v58  ;;  %v1434_v11 = vsub.f32 1.0, %v1433_v4 }
 0x868   :  { %v1466_v7 = vadd.f32 %v1785_v46, %v1465_v60  ;;  %v1420_v31 = vmul.f32 %v1789_v51, %v1419_v9 }
 0x869   :  { %v1451_v14 = vadd.f32 %v1787_v22, %v1450_v63  ;;  %v1435_v55 = vmul.f32 %v1791_v59, %v1434_v11 }
 0x86a   :  { %v1470_v53 = vsel %vm1469_vm14, %v1785_v46, %v1466_v7  ;;  %v1421_v1 = vadd.f32 %v1789_v51, %v1420_v31 }
 0x86b   :  { %v1475_v6 = vsel %vm2315_vm9, %v1474_v24, %v1470_v53  ;;  %v1455_v26 = vsel %vm1454_vm15, %v1787_v22, %v1451_v14  ;;  %v1436_v61 = vadd.f32 %v1791_v59, %v1435_v55 }
 0x86c   :  { %v1480_v56 = vmul.f32 %v1475_v6, %v2282_v35  ;;  %v1460_v34 = vsel %vm2319_vm13, %v1459_v8, %v1455_v26  ;;  %v1425_v23 = vsel %vm1424_vm5, %v1789_v51, %v1421_v1 }
 0x86d   :  { %v1479_v19 = vmul.f32 %v1460_v34, %v2284_v36  ;;  %v1430_v40 = vsel %vm1427_vm6, %v1429_v52, %v1425_v23  ;;  %v1440_v35 = vsel %vm1439_vm7, %v1791_v59, %v1436_v61 }
 0x86e   :  { %v1484_v49 = vadd.f32 %v1480_v56, %v2057_v10  ;;  %v1445_v3 = vsel %vm1442_vm8, %v1444_v12, %v1440_v35  ;;  %v1477_v36 = vmul.f32 %v1430_v40, %v2286_v28 }
 0x86f   :  { %v1483_v16 = vadd.f32 %v1479_v19, %v2051_v2  ;;  %v1478_v41 = vmul.f32 %v1445_v3, %v2288_v38 }
 0x870   :  { %1529 = vmatpush.msrb.mxu2 %v1484_v49  ;;  %v1481_v10 = vadd.f32 %v1477_v36, %v2065_v30 }
 0x871   :  { %v1482_v20 = vadd.f32 %v1478_v41, %v2060_v15 }
 0x872   :  { %1530 = vmatpush.msrb.mxu2 %v1483_v16 }
 0x874   :  { %1531 = vmatpush.msrb.mxu2 %v1482_v20 }
 0x876   :  { %1532 = vmatpush.msrb.mxu2 %v1481_v10 }
 0x877   :  { %1621 = vmatmul.msk.f32.vlgmr.msrb.gmra.mxu2 %vm228_vm1, %v2297_v18 }
 0x87f   :  { %1622 = vmatmul.msk.f32.gmra.mxu2 %vm228_vm1, %v2302_v54 }
 0x881   :  { %v1492_v2 = vpop.permute.xlu0 %1491 }
 0x885   :  { %v1497_v15 = vpop.permute.xlu1 %1496 }
 0x887   :  { %1623 = vmatmul.msk.f32.gmra.mxu2 %vm228_vm1, %v2312_v45 }
 0x88f   :  { %1624 = vmatmul.msk.f32.gmra.mxu2 %vm228_vm1, %v1488_v13 }
 0x8a5   :  { %v1502_v30 = vpop.permute.xlu2 %1501 }
 0x8b6   :  { %v1507_v18 = vpop.permute.xlu1 %1506 }
 0x8fa   :  { %v1534_v28 = vpop.f32.mrf.mxu2 }
 0x8fb   :  { %v1535_v38 = vadd.f32 %v1534_v28, %v1492_v2 }
 0x8fd   :  { %1546 = vst [vmem:[#allocation2] sm:$0xff] %v1535_v38 }
 0x902   :  { %v1537_v42 = vpop.f32.mrf.mxu2 }
 0x903   :  { %v1538_v47 = vadd.f32 %v1537_v42, %v1497_v15 }
 0x905   :  { %1547 = vst [vmem:[#allocation2 + $0x8] sm:$0xff] %v1538_v47 }
 0x90a   :  { %v1540_v37 = vpop.f32.mrf.mxu2 }
 0x90b   :  { %v1541_v43 = vadd.f32 %v1540_v37, %v1502_v30 }
 0x90d   :  { %1548 = vst [vmem:[#allocation2 + $0x10] sm:$0xff] %v1541_v43 }
 0x912   :  { %v1543_v54 = vpop.f32.mrf.mxu2 }
 0x913   :  { %v1544_v44 = vadd.f32 %v1543_v54, %v1507_v18 }
 0x915   :  { %1549 = vst [vmem:[#allocation2 + $0x18] sm:$0xff] %v1544_v44 }
 0x916   :  { %1562 = dma.vmem_to_hbm [thread:$0]  %s1555_s17, 512, %s1557_s20, [#allocation3], %s1827_s21, %s1827_s21, %s1828_s22  }
 0x917   :  { %1818 = dma.done.wait [#allocation3], 512  }
 0x918   :  { %1819 = vsyncadd [#allocation3], 4294966784 }
 0x919   :  { %1567 = vsyncpa [#allocation3], 1 }

</bundles_post_ra>
